<compile_context>
chip_gen: v6e
topology: v6e:2x2x1
jax: 0.10.0
libtpu: 0.0.40
codegen_flags: <defaults>
</compile_context>

<pallas_src>
import math

import jax
import jax.numpy as jnp
import numpy as np
from jax.experimental import pallas as pl
from jax.experimental.pallas import tpu as pltpu


# ----------------------------------------------------------------------------
# Pallas kernel: SphericalGabor layer + ReLU MLP (optional skip) + final linear
# All activations are (features, T): features on sublanes, points on lanes.
# ----------------------------------------------------------------------------
def _make_inr_kernel(hidden_layers, skip, skip_idx, wavelet_dim, freq_enc_type):
    def kernel(x_ref, r02_ref, ab_ref, w1_ref, b1_ref, *rest):
        out_ref = rest[-1]
        rest = rest[:-1]

        x_in = x_ref[...]                       # (in_features, T) f32
        p = x_in[0:3, :]                        # (3, T) points

        # One fused rotation matmul for all wavelets.  Rows [0, W) are already
        # pre-scaled by (omega_0*omega*2*exp(dilate)) in the wrapper; rows
        # [W, 2W) are the raw third rotation rows (give z).
        pr = jnp.dot(r02_ref[...], p, preferred_element_type=jnp.float32)  # (2W, T)
        xr_s = pr[0:wavelet_dim, :]             # (W, T) pre-scaled x-coordinate
        zr = pr[wavelet_dim:, :]                # (W, T) z-coordinate

        ab = ab_ref[...]                        # (2W, 1) folded gauss coefficients
        g_a = ab[0:wavelet_dim, :]              # (W, 1)  -sg2*dil4*(2+1e-6)
        g_b = ab[wavelet_dim:, :]               # (W, 1)   sg2*dil4

        # Single shared reciprocal of the denominator.
        inv_denom = 1.0 / ((1.0 + 1e-6) + zr)
        phase = xr_s * inv_denom
        if freq_enc_type == 'cos':
            freq_term = jnp.cos(phase)
        else:
            freq_term = jnp.sin(phase)
        gauss_term = jnp.exp(g_a * inv_denom + g_b)   # affine-form exponent
        h = freq_term * gauss_term              # (W, T)

        # Gabor layer's out_linear + ReLU:  (H, W) @ (W, T)
        h = jnp.maximum(
            jnp.dot(w1_ref[...], h, preferred_element_type=jnp.float32) + b1_ref[...],
            0.0)

        # Hidden ReLU layers (skip-concat implemented as a split matmul:
        #   W @ cat([h, x_in]) == Wa @ h + Wb @ x_in )
        k = 0
        for i in range(hidden_layers):
            if skip and i == skip_idx:
                wa, wb, bb = rest[k], rest[k + 1], rest[k + 2]
                k += 3
                h = (jnp.dot(wa[...], h, preferred_element_type=jnp.float32)
                     + jnp.dot(wb[...], x_in, preferred_element_type=jnp.float32)
                     + bb[...])
            else:
                w, bb = rest[k], rest[k + 1]
                k += 2
                h = jnp.dot(w[...], h, preferred_element_type=jnp.float32) + bb[...]
            h = jnp.maximum(h, 0.0)

        # Final linear (no activation) -> lane-dense (out_features, T) store.
        wf, bf = rest[k], rest[k + 1]
        out_ref[...] = (jnp.dot(wf[...], h, preferred_element_type=jnp.float32)
                        + bf[...]).astype(out_ref.dtype)

    return kernel


# ----------------------------------------------------------------------------
# Tile / VMEM-limit selection helpers
# ----------------------------------------------------------------------------
def _pick_tile(n, requested):
    """Largest lane-dense (x128) divisor of n that is <= requested, preferring
    a grid with >= 4 steps (and an even step count) so both v7x TensorCores get
    work on the "parallel" axis."""
    assert n % 128 == 0, "number of points must be a multiple of 128"
    requested = max(128, min(int(requested), n))
    divisors = [t for t in range(128, n + 1, 128) if n % t == 0]
    cands = [t for t in divisors if t <= requested] or [divisors[0]]
    for min_steps in (4, 2, 1):
        good = [t for t in cands if n // t >= min_steps]
        if good:
            even = [t for t in good if (n // t) % 2 == 0]
            return max(even) if even else max(good)
    return max(cands)


def _vmem_limit_bytes(in_features, out_features, hidden_features, wavelet_dim,
                      tile, weight_shapes):
    """Rough per-step VMEM bound (double-buffered x/out blocks, (8,128)-padded
    weight blocks, live f32 intermediates) with 2x margin; clamped above v5e's
    16 MiB scoped default and below v7x's 64 MiB physical VMEM."""
    f32 = 4
    blocks = 2 * (in_features + out_features) * tile * f32
    interm = (2 * wavelet_dim + 6 * hidden_features) * tile * f32
    weights = 0
    for r, c in weight_shapes:
        weights += (-(-r // 8) * 8) * (-(-c // 128) * 128) * f32
    weights *= 2
    est = 2 * (blocks + interm + weights)
    return int(min(64 * 1024 * 1024, max(32 * 1024 * 1024, est)))


# ----------------------------------------------------------------------------
# Wrappers
# ----------------------------------------------------------------------------
def inr_forward_pallas_fm(x_fm, params, cfg, tile=8192):
    """Feature-major INR forward: x_fm (in_features, N) -> (out_features, N).

    Feature-major in/out keeps the point dimension on the 128-lane axis inside
    the kernel and avoids wrapper-side transpose HBM round trips (kernel HBM
    traffic is only ~24 B/point)."""
    in_features, N = x_fm.shape
    wavelet_dim = params['omega'].shape[-1]
    assert wavelet_dim % 8 == 0, "wavelet_dim must be a multiple of 8 (sublane split)"
    out_features = params['wf'].shape[0]
    hidden_features = params['w1'].shape[0]

    tile = _pick_tile(N, tile)

    # ---- parameter pre-folding (cheap O(wavelet_dim) XLA glue, runs once) ----
    # phase      = (omega_0*omega*2*exp(dilate)) * xr / denom   -> fold into R row 0
    # gauss_expo = -sigma_0*sigma^2*4*exp(dilate)^2*(1-z)/denom
    #            =  g_a / denom + g_b            (denom = 1 + 1e-6 + z)
    dil = jnp.exp(params['dilate']).reshape(-1, 1)                 # (W,1)
    om = (cfg['omega_0'] * params['omega']).reshape(-1, 1)         # (W,1)
    sg2 = (cfg['sigma_0'] * params['sigma'] * params['sigma']).reshape(-1, 1)
    r0_scaled = (2.0 * om * dil) * params['R0r']                   # (W,3)
    r02 = jnp.concatenate([r0_scaled, params['R2r']], axis=0)      # (2W,3)
    sg2dil4 = 4.0 * sg2 * dil * dil                                # (W,1)
    g_a = -(2.0 + 1e-6) * sg2dil4
    g_b = sg2dil4
    ab = jnp.concatenate([g_a, g_b], axis=0)                       # (2W,1)

    weight_arrays = [r02, ab, params['w1'], params['b1']]
    for hw in params['hidden']:
        weight_arrays += list(hw)
    weight_arrays += [params['wf'], params['bf']]

    col_map = lambda i: (0, i)
    full_map = lambda i: (0, 0)
    in_specs = [pl.BlockSpec((in_features, tile), col_map)]
    in_specs += [pl.BlockSpec(w.shape, full_map) for w in weight_arrays]
    out_spec = pl.BlockSpec((out_features, tile), col_map)

    kernel = _make_inr_kernel(cfg['hidden_layers'], cfg['skip'], cfg['skip_idx'],
                              wavelet_dim, cfg['freq_enc_type'])

    vmem_limit = _vmem_limit_bytes(in_features, out_features, hidden_features,
                                   wavelet_dim, tile,
                                   [w.shape for w in weight_arrays])

    return pl.pallas_call(
        kernel,
        out_shape=jax.ShapeDtypeStruct((out_features, N), jnp.float32),
        grid_spec=pltpu.PrefetchScalarGridSpec(
            num_scalar_prefetch=0,
            grid=(N // tile,),
            in_specs=in_specs,
            out_specs=out_spec),
        compiler_params=pltpu.CompilerParams(
            dimension_semantics=("parallel",),
            vmem_limit_bytes=vmem_limit),
    )(x_fm, *weight_arrays)


def inr_forward_pallas(x, params, cfg, tile=8192):
    """Batch-major convenience wrapper: x (N, in_features) -> (N, out_features).
    Prefer inr_forward_pallas_fm when the surrounding model can keep (C, N)
    layout — it avoids two transpose HBM round trips."""
    return inr_forward_pallas_fm(x.T, params, cfg, tile=tile).T


# ----------------------------------------------------------------------------
# Parameter construction (deterministic, mirrors INR.__init__ shapes; weights
# stored PyTorch-style as (out, in), biases as (out, 1)).
# ----------------------------------------------------------------------------
def init_inr_params(key, in_features, out_features, wavelet_dim,
                    hidden_features, hidden_layers, skip):
    ks = jax.random.split(key, 8 + hidden_layers + 1)
    f32 = jnp.float32

    omega = jax.random.normal(ks[0], (1, wavelet_dim), f32)
    sigma = jax.random.normal(ks[1], (1, wavelet_dim), f32)
    dilate = jax.random.normal(ks[2], (1, wavelet_dim), f32)
    u = jax.random.uniform(ks[3], (wavelet_dim,), f32)
    v = jax.random.uniform(ks[4], (wavelet_dim,), f32)
    w = jax.random.uniform(ks[5], (wavelet_dim,), f32)

    def linear(k, fin, fout):
        k1, k2 = jax.random.split(k)
        bound = 1.0 / math.sqrt(fin)
        W = jax.random.uniform(k1, (fout, fin), f32, -bound, bound)   # (out, in)
        b = jax.random.uniform(k2, (fout, 1), f32, -bound, bound)     # (out, 1)
        return W, b

    w1, b1 = linear(ks[6], wavelet_dim, hidden_features)

    skip_idx = math.ceil(hidden_layers / 2)
    hidden = []
    for i in range(hidden_layers):
        if skip and i == skip_idx:
            W, b = linear(ks[7 + i], hidden_features + in_features, hidden_features)
            hidden.append((W[:, :hidden_features], W[:, hidden_features:], b))
        else:
            W, b = linear(ks[7 + i], hidden_features, hidden_features)
            hidden.append((W, b))

    wf, bf = linear(ks[7 + hidden_layers], hidden_features, out_features)

    # --- per-wavelet rotation matrices (glue: O(wavelet_dim) parameter math) ---
    zeros = jnp.zeros(wavelet_dim, f32)
    ones = jnp.ones(wavelet_dim, f32)
    alpha = 2.0 * math.pi * u
    beta = jnp.arccos(jnp.clip(2.0 * v - 1.0, -1.0 + 1e-6, 1.0 - 1e-6))
    gamma = 2.0 * math.pi * w
    ca, cb, cg = jnp.cos(alpha), jnp.cos(beta), jnp.cos(gamma)
    sa, sb, sg = jnp.sin(alpha), jnp.sin(beta), jnp.sin(gamma)
    Rz_alpha = jnp.stack([jnp.stack([ca, -sa, zeros], 1),
                          jnp.stack([sa, ca, zeros], 1),
                          jnp.stack([zeros, zeros, ones], 1)], 1)
    Rx_beta = jnp.stack([jnp.stack([ones, zeros, zeros], 1),
                         jnp.stack([zeros, cb, -sb], 1),
                         jnp.stack([zeros, sb, cb], 1)], 1)
    Rz_gamma = jnp.stack([jnp.stack([cg, -sg, zeros], 1),
                          jnp.stack([sg, cg, zeros], 1),
                          jnp.stack([zeros, zeros, ones], 1)], 1)
    R = jnp.einsum('wij,wjk,wkl->wil', Rz_gamma, Rx_beta, Rz_alpha,
                   precision=jax.lax.Precision.HIGHEST)        # (W, 3, 3)
    R0r = R[:, 0, :]                                           # (W, 3) -- row 0 of each R
    R2r = R[:, 2, :]                                           # (W, 3) -- row 2 of each R

    return dict(omega=omega, sigma=sigma, dilate=dilate, R0r=R0r, R2r=R2r,
                w1=w1, b1=b1, hidden=hidden, wf=wf, bf=bf), skip_idx


# ----------------------------------------------------------------------------
# Pure-JAX reference (unfused original math, Precision.HIGHEST) for correctness
# ----------------------------------------------------------------------------
def inr_forward_ref(x, params, cfg):
    hp = jax.lax.Precision.HIGHEST
    p = x[:, 0:3]
    xr = jnp.dot(p, params['R0r'].T, precision=hp)            # (N, W)
    zr = jnp.dot(p, params['R2r'].T, precision=hp)            # (N, W)
    dil = jnp.exp(params['dilate'])
    denom = 1e-6 + 1.0 + zr
    freq_arg = 2.0 * dil * xr / denom
    gauss_arg = 4.0 * dil * dil * (1.0 - zr) / denom
    phase = cfg['omega_0'] * params['omega'] * freq_arg
    freq_term = jnp.cos(phase) if cfg['freq_enc_type'] == 'cos' else jnp.sin(phase)
    gauss_term = jnp.exp(-params['sigma'] * params['sigma'] * cfg['sigma_0'] * gauss_arg)
    h = jnp.maximum(jnp.dot(freq_term * gauss_term, params['w1'].T, precision=hp)
                    + params['b1'].T, 0.0)
    for i in range(cfg['hidden_layers']):
        hw = params['hidden'][i]
        if cfg['skip'] and i == cfg['skip_idx']:
            wa, wb, b = hw
            h = jnp.dot(h, wa.T, precision=hp) + jnp.dot(x, wb.T, precision=hp) + b.T
        else:
            w, b = hw
            h = jnp.dot(h, w.T, precision=hp) + b.T
        h = jnp.maximum(h, 0.0)
    return jnp.dot(h, params['wf'].T, precision=hp) + params['bf'].T


# ----------------------------------------------------------------------------
if __name__ == "__main__":
    # Small config consistent with the module's constructor.
    in_features = 3
    out_features = 3
    wavelet_dim = 16
    hidden_features = 32
    hidden_layers = 2
    skip = True
    omega_0 = 10.0
    sigma_0 = 10.0
    freq_enc_type = 'sin'

    key = jax.random.PRNGKey(0)
    kp, kx = jax.random.split(key)

    params, skip_idx = init_inr_params(kp, in_features, out_features, wavelet_dim,
                                       hidden_features, hidden_layers, skip)
    cfg = dict(hidden_layers=hidden_layers, skip=skip, skip_idx=skip_idx,
               omega_0=omega_0, sigma_0=sigma_0, freq_enc_type=freq_enc_type)

    # N points on the unit sphere (test-harness data prep; the production path
    # uses the feature-major array directly, no transposes around the kernel).
    N = 2048
    pts = jax.random.normal(kx, (N, in_features), jnp.float32)
    x = pts / jnp.linalg.norm(pts, axis=-1, keepdims=True)     # (N, 3)
    x_fm = x.T                                                 # (3, N) feature-major

    # Default tile=8192 is capped by _pick_tile to 512 here -> 4 grid steps
    # (amortizes per-step overhead, keeps both v7x TensorCores busy).
    out_fm = jax.block_until_ready(inr_forward_pallas_fm(x_fm, params, cfg))

    ref = jax.block_until_ready(inr_forward_ref(x, params, cfg))
    np.testing.assert_allclose(np.asarray(out_fm).T, np.asarray(ref),
                               rtol=5e-3, atol=5e-3)

    print("KERNEL_OK")
</pallas_src>

<mosaic_0001>
module attributes {stable_mosaic.version = 11 : i64} {
  func.func @kernel(%arg0: i32, %arg1: memref<3x512xf32, #tpu.memory_space<vmem>>, %arg2: memref<32x3xf32, #tpu.memory_space<vmem>>, %arg3: memref<32x1xf32, #tpu.memory_space<vmem>>, %arg4: memref<32x16xf32, #tpu.memory_space<vmem>>, %arg5: memref<32x1xf32, #tpu.memory_space<vmem>>, %arg6: memref<32x32xf32, #tpu.memory_space<vmem>>, %arg7: memref<32x1xf32, #tpu.memory_space<vmem>>, %arg8: memref<32x32xf32, #tpu.memory_space<vmem>>, %arg9: memref<32x3xf32, #tpu.memory_space<vmem>>, %arg10: memref<32x1xf32, #tpu.memory_space<vmem>>, %arg11: memref<3x32xf32, #tpu.memory_space<vmem>>, %arg12: memref<3x1xf32, #tpu.memory_space<vmem>>, %arg13: memref<3x512xf32, #tpu.memory_space<vmem>>) attributes {dimension_semantics = [#tpu.dimension_semantics<parallel>], iteration_bounds = array<i64: 4>, scalar_prefetch = 0 : i64, scratch_operands = 0 : i64, tpu.core_type = #tpu.core_type<tc>, window_params = [{transform_indices = @transform_0, window_bounds = array<i64: 3, 512>}, {pipeline_mode = #tpu.pipeline_mode<synchronous>, transform_indices = @transform_1, window_bounds = array<i64: 32, 3>}, {pipeline_mode = #tpu.pipeline_mode<synchronous>, transform_indices = @transform_2, window_bounds = array<i64: 32, 1>}, {pipeline_mode = #tpu.pipeline_mode<synchronous>, transform_indices = @transform_3, window_bounds = array<i64: 32, 16>}, {pipeline_mode = #tpu.pipeline_mode<synchronous>, transform_indices = @transform_4, window_bounds = array<i64: 32, 1>}, {pipeline_mode = #tpu.pipeline_mode<synchronous>, transform_indices = @transform_5, window_bounds = array<i64: 32, 32>}, {pipeline_mode = #tpu.pipeline_mode<synchronous>, transform_indices = @transform_6, window_bounds = array<i64: 32, 1>}, {pipeline_mode = #tpu.pipeline_mode<synchronous>, transform_indices = @transform_7, window_bounds = array<i64: 32, 32>}, {pipeline_mode = #tpu.pipeline_mode<synchronous>, transform_indices = @transform_8, window_bounds = array<i64: 32, 3>}, {pipeline_mode = #tpu.pipeline_mode<synchronous>, transform_indices = @transform_9, window_bounds = array<i64: 32, 1>}, {pipeline_mode = #tpu.pipeline_mode<synchronous>, transform_indices = @transform_10, window_bounds = array<i64: 3, 32>}, {pipeline_mode = #tpu.pipeline_mode<synchronous>, transform_indices = @transform_11, window_bounds = array<i64: 3, 1>}, {transform_indices = @transform_12, window_bounds = array<i64: 3, 512>}]} {
    %c0 = arith.constant 0 : index
    %c0_0 = arith.constant 0 : index
    %0 = vector.load %arg1[%c0, %c0_0] : memref<3x512xf32, #tpu.memory_space<vmem>>, vector<3x512xf32>
    %c0_1 = arith.constant 0 : index
    %c0_2 = arith.constant 0 : index
    %1 = vector.load %arg2[%c0_1, %c0_2] : memref<32x3xf32, #tpu.memory_space<vmem>>, vector<32x3xf32>
    %cst = arith.constant dense<0.000000e+00> : vector<32x512xf32>
    %2 = tpu.matmul %1, %0, %cst {dimension_numbers = #tpu.dot_dimension_numbers<[1], [0], [0], [1], [0, 0, 1, 1], [], []>} : vector<32x3xf32>, vector<3x512xf32>, vector<32x512xf32> -> vector<32x512xf32>
    %3 = vector.extract_strided_slice %2 {offsets = [0, 0], sizes = [16, 512], strides = [1, 1]} : vector<32x512xf32> to vector<16x512xf32>
    %4 = vector.extract_strided_slice %2 {offsets = [16, 0], sizes = [16, 512], strides = [1, 1]} : vector<32x512xf32> to vector<16x512xf32>
    %c0_3 = arith.constant 0 : index
    %c0_4 = arith.constant 0 : index
    %5 = vector.load %arg3[%c0_3, %c0_4] : memref<32x1xf32, #tpu.memory_space<vmem>>, vector<32x1xf32>
    %6 = vector.extract_strided_slice %5 {offsets = [0, 0], sizes = [16, 1], strides = [1, 1]} : vector<32x1xf32> to vector<16x1xf32>
    %7 = vector.extract_strided_slice %5 {offsets = [16, 0], sizes = [16, 1], strides = [1, 1]} : vector<32x1xf32> to vector<16x1xf32>
    %cst_5 = arith.constant 1.00000095 : f32
    %8 = vector.broadcast %cst_5 : f32 to vector<16x512xf32>
    %9 = arith.addf %8, %4 : vector<16x512xf32>
    %cst_6 = arith.constant 1.000000e+00 : f32
    %10 = vector.broadcast %cst_6 : f32 to vector<16x512xf32>
    %11 = arith.divf %10, %9 : vector<16x512xf32>
    %12 = arith.mulf %3, %11 : vector<16x512xf32>
    %13 = math.sin %12 : vector<16x512xf32>
    %14 = vector.broadcast %6 : vector<16x1xf32> to vector<16x512xf32>
    %15 = arith.mulf %14, %11 : vector<16x512xf32>
    %16 = vector.broadcast %7 : vector<16x1xf32> to vector<16x512xf32>
    %17 = arith.addf %15, %16 : vector<16x512xf32>
    %18 = math.exp %17 : vector<16x512xf32>
    %19 = arith.mulf %13, %18 : vector<16x512xf32>
    %c0_7 = arith.constant 0 : index
    %c0_8 = arith.constant 0 : index
    %20 = vector.load %arg4[%c0_7, %c0_8] : memref<32x16xf32, #tpu.memory_space<vmem>>, vector<32x16xf32>
    %cst_9 = arith.constant dense<0.000000e+00> : vector<32x512xf32>
    %21 = tpu.matmul %20, %19, %cst_9 {dimension_numbers = #tpu.dot_dimension_numbers<[1], [0], [0], [1], [0, 0, 1, 1], [], []>} : vector<32x16xf32>, vector<16x512xf32>, vector<32x512xf32> -> vector<32x512xf32>
    %c0_10 = arith.constant 0 : index
    %c0_11 = arith.constant 0 : index
    %22 = vector.load %arg5[%c0_10, %c0_11] : memref<32x1xf32, #tpu.memory_space<vmem>>, vector<32x1xf32>
    %23 = vector.broadcast %22 : vector<32x1xf32> to vector<32x512xf32>
    %24 = arith.addf %21, %23 : vector<32x512xf32>
    %cst_12 = arith.constant 0.000000e+00 : f32
    %25 = vector.broadcast %cst_12 : f32 to vector<32x512xf32>
    %26 = arith.maximumf %24, %25 : vector<32x512xf32>
    %c0_13 = arith.constant 0 : index
    %c0_14 = arith.constant 0 : index
    %27 = vector.load %arg6[%c0_13, %c0_14] : memref<32x32xf32, #tpu.memory_space<vmem>>, vector<32x32xf32>
    %cst_15 = arith.constant dense<0.000000e+00> : vector<32x512xf32>
    %28 = tpu.matmul %27, %26, %cst_15 {dimension_numbers = #tpu.dot_dimension_numbers<[1], [0], [0], [1], [0, 0, 1, 1], [], []>} : vector<32x32xf32>, vector<32x512xf32>, vector<32x512xf32> -> vector<32x512xf32>
    %c0_16 = arith.constant 0 : index
    %c0_17 = arith.constant 0 : index
    %29 = vector.load %arg7[%c0_16, %c0_17] : memref<32x1xf32, #tpu.memory_space<vmem>>, vector<32x1xf32>
    %30 = vector.broadcast %29 : vector<32x1xf32> to vector<32x512xf32>
    %31 = arith.addf %28, %30 : vector<32x512xf32>
    %cst_18 = arith.constant 0.000000e+00 : f32
    %32 = vector.broadcast %cst_18 : f32 to vector<32x512xf32>
    %33 = arith.maximumf %31, %32 : vector<32x512xf32>
    %c0_19 = arith.constant 0 : index
    %c0_20 = arith.constant 0 : index
    %34 = vector.load %arg8[%c0_19, %c0_20] : memref<32x32xf32, #tpu.memory_space<vmem>>, vector<32x32xf32>
    %cst_21 = arith.constant dense<0.000000e+00> : vector<32x512xf32>
    %35 = tpu.matmul %34, %33, %cst_21 {dimension_numbers = #tpu.dot_dimension_numbers<[1], [0], [0], [1], [0, 0, 1, 1], [], []>} : vector<32x32xf32>, vector<32x512xf32>, vector<32x512xf32> -> vector<32x512xf32>
    %c0_22 = arith.constant 0 : index
    %c0_23 = arith.constant 0 : index
    %36 = vector.load %arg9[%c0_22, %c0_23] : memref<32x3xf32, #tpu.memory_space<vmem>>, vector<32x3xf32>
    %cst_24 = arith.constant dense<0.000000e+00> : vector<32x512xf32>
    %37 = tpu.matmul %36, %0, %cst_24 {dimension_numbers = #tpu.dot_dimension_numbers<[1], [0], [0], [1], [0, 0, 1, 1], [], []>} : vector<32x3xf32>, vector<3x512xf32>, vector<32x512xf32> -> vector<32x512xf32>
    %38 = arith.addf %35, %37 : vector<32x512xf32>
    %c0_25 = arith.constant 0 : index
    %c0_26 = arith.constant 0 : index
    %39 = vector.load %arg10[%c0_25, %c0_26] : memref<32x1xf32, #tpu.memory_space<vmem>>, vector<32x1xf32>
    %40 = vector.broadcast %39 : vector<32x1xf32> to vector<32x512xf32>
    %41 = arith.addf %38, %40 : vector<32x512xf32>
    %cst_27 = arith.constant 0.000000e+00 : f32
    %42 = vector.broadcast %cst_27 : f32 to vector<32x512xf32>
    %43 = arith.maximumf %41, %42 : vector<32x512xf32>
    %c0_28 = arith.constant 0 : index
    %c0_29 = arith.constant 0 : index
    %44 = vector.load %arg11[%c0_28, %c0_29] : memref<3x32xf32, #tpu.memory_space<vmem>>, vector<3x32xf32>
    %cst_30 = arith.constant dense<0.000000e+00> : vector<3x512xf32>
    %45 = tpu.matmul %44, %43, %cst_30 {dimension_numbers = #tpu.dot_dimension_numbers<[1], [0], [0], [1], [0, 0, 1, 1], [], []>} : vector<3x32xf32>, vector<32x512xf32>, vector<3x512xf32> -> vector<3x512xf32>
    %c0_31 = arith.constant 0 : index
    %c0_32 = arith.constant 0 : index
    %46 = vector.load %arg12[%c0_31, %c0_32] : memref<3x1xf32, #tpu.memory_space<vmem>>, vector<3x1xf32>
    %47 = vector.broadcast %46 : vector<3x1xf32> to vector<3x512xf32>
    %48 = arith.addf %45, %47 : vector<3x512xf32>
    %c0_33 = arith.constant 0 : index
    %c0_34 = arith.constant 0 : index
    %49 = vector.load %arg13[%c0_33, %c0_34] : memref<3x512xf32, #tpu.memory_space<vmem>>, vector<3x512xf32>
    tpu.vector_store %arg13[%c0_33, %c0_34], %48 {strides = array<i32>} : memref<3x512xf32, #tpu.memory_space<vmem>>, vector<3x512xf32>,
    return
  }
  func.func @transform_0(%arg0: i32) -> (i32, i32) {
    %c0_i32 = arith.constant 0 : i32
    %c0_i32_0 = arith.constant 0 : i32
    return %c0_i32, %arg0 : i32, i32
  }
  func.func @transform_1(%arg0: i32) -> (i32, i32) {
    %c0_i32 = arith.constant 0 : i32
    %c0_i32_0 = arith.constant 0 : i32
    %c0_i32_1 = arith.constant 0 : i32
    return %c0_i32, %c0_i32_0 : i32, i32
  }
  func.func @transform_2(%arg0: i32) -> (i32, i32) {
    %c0_i32 = arith.constant 0 : i32
    %c0_i32_0 = arith.constant 0 : i32
    %c0_i32_1 = arith.constant 0 : i32
    return %c0_i32, %c0_i32_0 : i32, i32
  }
  func.func @transform_3(%arg0: i32) -> (i32, i32) {
    %c0_i32 = arith.constant 0 : i32
    %c0_i32_0 = arith.constant 0 : i32
    %c0_i32_1 = arith.constant 0 : i32
    return %c0_i32, %c0_i32_0 : i32, i32
  }
  func.func @transform_4(%arg0: i32) -> (i32, i32) {
    %c0_i32 = arith.constant 0 : i32
    %c0_i32_0 = arith.constant 0 : i32
    %c0_i32_1 = arith.constant 0 : i32
    return %c0_i32, %c0_i32_0 : i32, i32
  }
  func.func @transform_5(%arg0: i32) -> (i32, i32) {
    %c0_i32 = arith.constant 0 : i32
    %c0_i32_0 = arith.constant 0 : i32
    %c0_i32_1 = arith.constant 0 : i32
    return %c0_i32, %c0_i32_0 : i32, i32
  }
  func.func @transform_6(%arg0: i32) -> (i32, i32) {
    %c0_i32 = arith.constant 0 : i32
    %c0_i32_0 = arith.constant 0 : i32
    %c0_i32_1 = arith.constant 0 : i32
    return %c0_i32, %c0_i32_0 : i32, i32
  }
  func.func @transform_7(%arg0: i32) -> (i32, i32) {
    %c0_i32 = arith.constant 0 : i32
    %c0_i32_0 = arith.constant 0 : i32
    %c0_i32_1 = arith.constant 0 : i32
    return %c0_i32, %c0_i32_0 : i32, i32
  }
  func.func @transform_8(%arg0: i32) -> (i32, i32) {
    %c0_i32 = arith.constant 0 : i32
    %c0_i32_0 = arith.constant 0 : i32
    %c0_i32_1 = arith.constant 0 : i32
    return %c0_i32, %c0_i32_0 : i32, i32
  }
  func.func @transform_9(%arg0: i32) -> (i32, i32) {
    %c0_i32 = arith.constant 0 : i32
    %c0_i32_0 = arith.constant 0 : i32
    %c0_i32_1 = arith.constant 0 : i32
    return %c0_i32, %c0_i32_0 : i32, i32
  }
  func.func @transform_10(%arg0: i32) -> (i32, i32) {
    %c0_i32 = arith.constant 0 : i32
    %c0_i32_0 = arith.constant 0 : i32
    %c0_i32_1 = arith.constant 0 : i32
    return %c0_i32, %c0_i32_0 : i32, i32
  }
  func.func @transform_11(%arg0: i32) -> (i32, i32) {
    %c0_i32 = arith.constant 0 : i32
    %c0_i32_0 = arith.constant 0 : i32
    %c0_i32_1 = arith.constant 0 : i32
    return %c0_i32, %c0_i32_0 : i32, i32
  }
  func.func @transform_12(%arg0: i32) -> (i32, i32) {
    %c0_i32 = arith.constant 0 : i32
    %c0_i32_0 = arith.constant 0 : i32
    return %c0_i32, %arg0 : i32, i32
  }
}

</mosaic_0001>

<bundles_post_ra>
// kernel: tpu_custom_call.1
= control target key start
LH: loop header
LB: loop body
LE: loop exit
PB: predicated region body
PF: predicated region fallthrough
CT: control target
= control target key end

     0   :  { %s4225_s0 = inlined_call_operand.vmem [shape: f32[3,2048], index: 0, kind: input, shape index: {}]   ;;  %s4226_s1 = inlined_call_operand.vmem [shape: f32[32,3], index: 1, kind: input, shape index: {}]   ;;  %s4227_s2 = inlined_call_operand.vmem [shape: f32[32,1], index: 2, kind: input, shape index: {}]   ;;  %s4228_s3 = inlined_call_operand.vmem [shape: f32[32,16], index: 3, kind: input, shape index: {}]   ;;  %s4229_s4 = inlined_call_operand.vmem [shape: f32[32,1], index: 4, kind: input, shape index: {}]   ;;  %s4230_s5 = inlined_call_operand.vmem [shape: f32[32,32], index: 5, kind: input, shape index: {}]   ;;  %s4231_s6 = inlined_call_operand.vmem [shape: f32[32,1], index: 6, kind: input, shape index: {}]   ;;  %s4232_s7 = inlined_call_operand.vmem [shape: f32[32,32], index: 7, kind: input, shape index: {}]   ;;  %s4233_s8 = inlined_call_operand.vmem [shape: f32[32,3], index: 8, kind: input, shape index: {}]   ;;  %s4234_s9 = inlined_call_operand.vmem [shape: f32[32,1], index: 9, kind: input, shape index: {}]   ;;  %s4235_s10 = inlined_call_operand.vmem [shape: f32[3,32], index: 10, kind: input, shape index: {}]   ;;  %s4236_s11 = inlined_call_operand.vmem [shape: f32[3,1], index: 11, kind: input, shape index: {}]   ;;  %s4237_s12 = inlined_call_operand.hbm [shape: f32[3,2048], index: 12, kind: output, shape index: {}]  }
   0x1   :  { %4257 = sst [smem:[#allocation8_spill]] %s4225_s0 }
   0x2   :  { %17 = vsyncpa [#allocation3], 0 }
   0x3   :  { %19 = vsyncpa [#allocation3 + $0x1], 0  ;;  %s3083_s21 = smov 0   ;;  %s3085_s22 = smov 0  }
   0x4   :  { %s3087_s23 = smov 0   ;;  %s3089_s24 = smov 0  }
   0x5 LB: > { %4258 = sst [smem:[#allocation5_spill]] %s3003_s23  ;;  %s3104_s25 = sadd.s32 4294967295, %s3007_s24   ;;  %s3007_s24 = sphi %s3089_s24, %s4296_s24   ;;  %s3003_s23 = sphi %s3087_s23, %s4293_s23   ;;  %s2999_s22 = sphi %s3085_s22, %s4295_s22   ;;  %s2995_s21 = sphi %s3083_s21, %s4294_s21  }
   0x6   : > { %s2703_s26 = sadd.s32 4294967294, %s3007_s24   ;;  %s3108_s27 = sadd.s32 1, %s3007_s24  }
   0x7   : > { %s289_s28 = sadd.s32 1, %s3003_s23  ;;  %s286_s29 = ssub.s32 %s3007_s24, %s3108_s27 }
   0x8   : > { %p299_p0 = scmp.ne.s32.totalorder %s3003_s23, %s2999_s22  ;;  %p287_p1 = scmp.eq.s32.totalorder %s286_s29, 0 }
   0x9   : > { %p300_p2 = scmp.eq.s32.totalorder %s3104_s25, 3  ;;  %p305_p3 = scmp.ne.s32.totalorder %s2999_s22, %s2995_s21 }
   0xa   : > { %p306_p4 = scmp.eq.s32.totalorder %s2703_s26, 3  ;;  %p2706_p7 = scmp.ge.s32.totalorder %s3007_s24, 1 }
   0xb   : > { %s3119_s30 = scalar_select %p287_p1, %s3003_s23, %s289_s28  }
   0xc   : > { %p3121_p5 = por %p300_p2, %p299_p0  ;;  %p3125_p6 = por %p306_p4, %p305_p3 }
   0xd   : > { %4259 = sst [smem:[#allocation6_spill]] %s3119_s30  ;;  %p366_p8 = scmp.lt.s32.totalorder %s3007_s24, 5 }
   0xf   : > { %p367_p9 = pnand %p2706_p7, %p366_p8 }
  0x11   : > { %370 = sbr.rel (%p367_p9) target bundleno = 1373 (0x55d), region = 68 }
  0x16   : > { %s2708_s15 = sshll.u32 %s3104_s25, 2  ;;  %v4239_v0 = vmov 0.0   ;;  %v626_v1 = vld [vmem:[%s4227_s2 + $0x8] sm:$0xff]  ;;  %v3010_v2 = vmov 0   ;;  %v628_v3 = vld [vmem:[%s4227_s2 + $0x18] sm:$0xff]  ;;  %v625_v4 = vld [vmem:[%s4227_s2] sm:$0xff] }
  0x17   : > { %p409_p10 = scmp.lt.s32.totalorder %s2708_s15, 15  ;;  %511 = vmatprep.mubr.f32.mxu0 %v4239_v0  ;;  %600 = vmatprep.mubr.f32.mxu1 %v4239_v0  ;;  %v627_v5 = vld [vmem:[%s4227_s2 + $0x10] sm:$0xff]  ;;  %s4262_s0 = sld [smem:[#allocation8_spill]]  ;;  %vm438_vm0 = vcmask 1042432   ;;  %v417_v10 = vld [vmem:[%s4226_s1] sm:$0xff]  ;;  %vm425_vm1 = vcmask 23552  }
  0x18   : > { %2877 = vset.pattern.permute.xlu0 %v3010_v2  ;;  %2878 = vset.pattern.permute.xlu1 %v3010_v2  ;;  %v1560_v11 = vld [vmem:[%s4229_s4 + $0x18] sm:$0xff]  ;;  %v1559_v12 = vld [vmem:[%s4229_s4 + $0x10] sm:$0xff]  ;;  %v418_v13 = vld [vmem:[%s4226_s1 + $0x8] sm:$0xff]  ;;  %s405_s28 = sand.u32 1, %s2999_s22   ;;  %s2797_s17 = sshll.u32 %s3104_s25, 8 }
  0x19   : > { %s4298_s15 = smov (!%p409_p10, %s2708_s15), 15  ;;  %1500 = vperm.xlu0 %2877, %v626_v1   ;;  %1518 = vperm.xlu1 %2878, %v628_v3   ;;  %v1558_v14 = vld [vmem:[%s4229_s4 + $0x8] sm:$0xff]  ;;  %v1557_v15 = vld [vmem:[%s4229_s4] sm:$0xff]  ;;  %v419_v16 = vld [vmem:[%s4226_s1 + $0x10] sm:$0xff]  ;;  %s2707_s29 = sshll.u32 %s405_s28, 4 }
  0x1a   : > { %s2709_s16 = sshll.u32 %s4298_s15, 2  ;;  %v1795_v17 = vld [vmem:[%s4231_s6 + $0x18] sm:$0xff]  ;;  %v1794_v18 = vld [vmem:[%s4231_s6 + $0x10] sm:$0xff]  ;;  %v1793_v20 = vld [vmem:[%s4231_s6 + $0x8] sm:$0xff]  ;;  %s2642_s30 = scalar_lea.hbm %s4237_s12, %s2797_s17 }
  0x1b   : > { %v420_v19 = vld [vmem:[%s4226_s1 + $0x18] sm:$0xff]  ;;  %v1792_v21 = vld [vmem:[%s4231_s6] sm:$0xff]  ;;  %v2413_v23 = vld [vmem:[%s4234_s9 + $0x10] sm:$0xff]  ;;  %s2630_s15 = scalar_lea.sflag [#allocation3], %s405_s28  ;;  %s3017_s26 = smov [#allocation2]  }
  0x1c   : > { %v2414_v22 = vld [vmem:[%s4234_s9 + $0x18] sm:$0xff]  ;;  %v2412_v24 = vld [vmem:[%s4234_s9 + $0x8] sm:$0xff]  ;;  %v2411_v25 = vld [vmem:[%s4234_s9] sm:$0xff] }
  0x1d   : > { %s3149_s23 = scalar_lea.vmem %s4262_s0, %s2709_s16  ;;  %1495 = vperm.xlu0 %2877, %v625_v4   ;;  %1513 = vperm.xlu1 %2878, %v627_v5   ;;  %v2468_v26 = vld [vmem:[%s4236_s11] sm:$0x7]  ;;  %s407_s16 = scalar_lea.vmem [#allocation2], %s2707_s29 }
  0x1e   : > { %v415_v6 = vld [vmem:[%s3149_s23] sm:$0x77]  ;;  %v416_v7 = vld [vmem:[%s3149_s23 + $0x8] sm:$0x77]  ;;  %s2644_s18 = sshll.u32 %s407_s16, 4  ;;  %s2951_s29 = sshll.u32 %s3017_s26, 4  ;;  %s2645_s18 = int_to_ptr.vmem [resolvable:$true] %s2644_s18  ;;  %s2952_s29 = int_to_ptr.vmem [resolvable:$false] %s2951_s29 }
  0x1f   : > { %v3153_v8 = vcombine.high %v415_v6, %v415_v6  ;;  %v3155_v9 = vcombine.high %v416_v7, %v416_v7  ;;  %s2947_s20 = scalar_lea.vmem %s2645_s18, 256  ;;  %s2953_s25 = scalar_lea.vmem %s2952_s29, 512 }
  0x20   : > { %p2948_p11 = scmp.ne.s32.totalorder %s2645_s18, %s2947_s20  ;;  %p2954_p0 = scmp.lt.s32.totalorder %s2645_s18, %s2952_s29 }
  0x21   : > { %4263 = vst [vmem:[#allocation7_spill] sm:$0xff] %v3155_v9  ;;  %2710 = vmatprep.subr.msk.mxu0 %vm438_vm0, %v3153_v8  ;;  %2716 = vmatprep.subr.msk.mxu1 %vm438_vm0, %v3155_v9  ;;  %p2955_p1 = scmp.lt.s32.totalorder %s2953_s25, %s2947_s20 }
  0x22   : > { %2711 = vmatpush1.msk.msra.mxu0 %vm438_vm0, %v415_v6  ;;  %2717 = vmatpush1.msk.msra.mxu1 %vm438_vm0, %v416_v7  ;;  %p2949_p12 = pnand %p2948_p11, %p3121_p5 }
  0x23   : > { %2712 = vmatmul.mubr.msk.f32.vlgmr.msra.gmra.mxu0 %vm425_vm1, %v417_v10  ;;  %2718 = vmatmul.mubr.msk.f32.vlgmr.msra.gmra.mxu1 %vm425_vm1, %v417_v10  ;;  %p2956_p2 = por %p2955_p1, %p2954_p0 }
  0x24   : > { %517 = vmatprep.mubr.f32.mxu0 %v4239_v0  ;;  %606 = vmatprep.mubr.f32.mxu1 %v4239_v0  ;;  %p2950_p13 = pneg %p2949_p12 }
  0x25   : > { %1578 = vperm.xlu0 %2877, %v1560_v11   ;;  %1573 = vperm.xlu1 %2878, %v1559_v12  }
  0x26   : > { %p2957_p3 = pnand %p2956_p2, %p2950_p13 }
  0x27   : > { %2713 = vmatmul.mubr.msk.f32.gmra.mxu0 %vm425_vm1, %v418_v13  ;;  %2719 = vmatmul.mubr.msk.f32.gmra.mxu1 %vm425_vm1, %v418_v13 }
  0x28   : > { %523 = vmatprep.mubr.f32.mxu0 %v4239_v0  ;;  %612 = vmatprep.mubr.f32.mxu1 %v4239_v0 }
  0x29   : > { %1568 = vperm.xlu0 %2877, %v1558_v14   ;;  %1563 = vperm.xlu1 %2878, %v1557_v15  }
  0x2b   : > { %2714 = vmatmul.mubr.msk.f32.gmra.mxu0 %vm425_vm1, %v419_v16  ;;  %2720 = vmatmul.mubr.msk.f32.gmra.mxu1 %vm425_vm1, %v419_v16 }
  0x2c   : > { %529 = vmatprep.mubr.f32.mxu0 %v4239_v0  ;;  %618 = vmatprep.mubr.f32.mxu1 %v4239_v0 }
  0x2d   : > { %1813 = vperm.xlu0 %2877, %v1795_v17   ;;  %1808 = vperm.xlu1 %2878, %v1794_v18  }
  0x2f   : > { %2715 = vmatmul.mubr.msk.f32.gmra.mxu0 %vm425_vm1, %v420_v19  ;;  %2721 = vmatmul.mubr.msk.f32.gmra.mxu1 %vm425_vm1, %v420_v19 }
  0x30   : > { %1658 = vmatprep.mubr.f32.mxu0 %v4239_v0  ;;  %1747 = vmatprep.mubr.f32.mxu1 %v4239_v0 }
  0x31   : > { %1803 = vperm.xlu0 %2877, %v1793_v20   ;;  %1798 = vperm.xlu1 %2878, %v1792_v21  }
  0x35   : > { %2432 = vperm.xlu0 %2877, %v2414_v22   ;;  %2427 = vperm.xlu1 %2878, %v2413_v23  }
  0x39   : > { %2422 = vperm.xlu0 %2877, %v2412_v24   ;;  %2417 = vperm.xlu1 %2878, %v2411_v25  }
  0x3d   : > { %2471 = vperm.xlu0 %2877, %v2468_v26  }
  0xe3   : > { %v513_v27 = vpop.f32.mrf.mxu0  ;;  %v602_v28 = vpop.f32.mrf.mxu1 }
  0xe5   : > { %v515_v29 = vpop.f32.mrf.mxu0  ;;  %v604_v30 = vpop.f32.mrf.mxu1 }
  0xe7   : > { %v519_v31 = vpop.f32.mrf.mxu0  ;;  %v608_v32 = vpop.f32.mrf.mxu1 }
  0xe9   : > { %v521_v33 = vpop.f32.mrf.mxu0  ;;  %v610_v34 = vpop.f32.mrf.mxu1 }
  0xeb   : > { %v525_v35 = vpop.f32.mrf.mxu0  ;;  %v614_v36 = vpop.f32.mrf.mxu1 }
  0xec   : > { %v629_v37 = vadd.f32 1.000001, %v525_v35  ;;  %v631_v38 = vadd.f32 1.000001, %v614_v36 }
  0xed   : > { %v527_v39 = vpop.f32.mrf.mxu0  ;;  %v616_v40 = vpop.f32.mrf.mxu1 }
  0xee   : > { %2881 = vrcp.f32 %v629_v37  ;;  %v630_v41 = vadd.f32 1.000001, %v527_v39  ;;  %v632_v42 = vadd.f32 1.000001, %v616_v40 }
  0xef   : > { %2883 = vrcp.f32 %v631_v38  ;;  %v531_v43 = vpop.f32.mrf.mxu0  ;;  %v620_v44 = vpop.f32.mrf.mxu1 }
  0xf0   : > { %2885 = vrcp.f32 %v630_v41  ;;  %v633_v45 = vadd.f32 1.000001, %v531_v43  ;;  %v635_v48 = vadd.f32 1.000001, %v620_v44 }
  0xf1   : > { %2887 = vrcp.f32 %v632_v42  ;;  %v533_v46 = vpop.f32.mrf.mxu0  ;;  %v622_v47 = vpop.f32.mrf.mxu1 }
  0xf2   : > { %v634_v49 = vadd.f32 1.000001, %v533_v46  ;;  %v636_v50 = vadd.f32 1.000001, %v622_v47  ;;  %2889 = vrcp.f32 %v633_v45 }
  0xf4   : > { %2891 = vrcp.f32 %v634_v49 }
  0xf5   : > { %2893 = vrcp.f32 %v636_v50 }
  0xf6   : > { %2895 = vrcp.f32 %v635_v48 }
  0xfb   : > { %v3230_v51 = vpop.eup %2881 }
  0xfc   : > { %v3232_v52 = vpop.eup %2883  ;;  %v3235_v53 = vmul.f32 %v3230_v51, %v513_v27 }
  0xfd   : > { %v2886_v54 = vpop.eup %2885  ;;  %v3238_v55 = vmul.f32 %v3232_v52, %v602_v28  ;;  %v1501_v28 = vpop.permute.xlu0 %1500 }
  0xfe   : > { %v3240_v56 = vpop.eup %2887  ;;  %v664_v57 = vand.u32 2139095040, %v3235_v53  ;;  %v3243_v58 = vmul.f32 %v2886_v54, %v515_v29 }
  0xff   : > { %v3246_v59 = vmul.f32 %v3240_v56, %v604_v30  ;;  %v2890_v60 = vpop.eup %2889  ;;  %v872_v2 = vand.u32 2139095040, %v3238_v55 }
 0x100   : > { %v768_v61 = vand.u32 2139095040, %v3243_v58  ;;  %v665_v1 = vshrl.u32 %v664_v57, 23  ;;  %v3253_v7 = vmul.f32 %v2890_v60, %v519_v31  ;;  %v1507_v43 = vmul.f32 %v2890_v60, %v1501_v28  ;;  %v3286_v60 = vpop.permute.xlu1 %1518 }
 0x101   : > { %v2892_v62 = vpop.eup %2891  ;;  %v976_v6 = vand.u32 2139095040, %v3246_v59  ;;  %v873_v13 = vshrl.u32 %v872_v2, 23  ;;  %v3265_v42 = vpop.permute.xlu0 %1495 }
 0x102   : > { %v2894_v63 = vpop.eup %2893  ;;  %v3250_v3 = vmul.f32 %v2892_v62, %v521_v33  ;;  %v769_v5 = vshrl.u32 %v768_v61, 23  ;;  %v2722_v12 = vadd.s32 4294967169, %v665_v1  ;;  %v1080_v17 = vand.u32 2139095040, %v3253_v7 }
 0x103   : > { %v2896_v4 = vpop.eup %2895  ;;  %v3256_v11 = vmul.f32 %v2894_v63, %v610_v34  ;;  %v977_v16 = vshrl.u32 %v976_v6, 23  ;;  %v2730_v21 = vadd.s32 4294967169, %v873_v13  ;;  %v3268_v44 = vmul.f32 %v2886_v54, %v3265_v42 }
 0x104   : > { %v1184_v10 = vand.u32 2139095040, %v3250_v3  ;;  %v3258_v14 = vmul.f32 %v2896_v4, %v608_v32  ;;  %v2726_v15 = vadd.s32 4294967169, %v769_v5  ;;  %v671_v20 = vadd.s32 1, %v2722_v12 }
 0x105   : > { %v1392_v19 = vand.u32 2139095040, %v3256_v11  ;;  %v2734_v24 = vadd.s32 4294967169, %v977_v16  ;;  %v1081_v25 = vshrl.u32 %v1080_v17, 23  ;;  %v879_v29 = vadd.s32 1, %v2730_v21 }
 0x106   : > { %v1185_v18 = vshrl.u32 %v1184_v10, 23  ;;  %v1288_v22 = vand.u32 2139095040, %v3258_v14  ;;  %v775_v23 = vadd.s32 1, %v2726_v15  ;;  %vm672_vm2 = vcmp.gt.s32.totalorder %v671_v20, 0 }
 0x107   : > { %v1393_v27 = vshrl.u32 %v1392_v19, 23  ;;  %v983_v32 = vadd.s32 1, %v2734_v24  ;;  %v2738_v33 = vadd.s32 4294967169, %v1081_v25  ;;  %v3263_v36 = vsel %vm672_vm2, %v671_v20, 0 }
 0x108   : > { %v2742_v26 = vadd.s32 4294967169, %v1185_v18  ;;  %v1289_v30 = vshrl.u32 %v1288_v22, 23  ;;  %vm776_vm3 = vcmp.gt.s32.totalorder %v775_v23, 0  ;;  %vm880_vm5 = vcmp.gt.s32.totalorder %v879_v29, 0 }
 0x109   : > { %v2750_v34 = vadd.s32 4294967169, %v1393_v27  ;;  %v777_v37 = vsel %vm776_vm3, %v775_v23, 0  ;;  %vm984_vm6 = vcmp.gt.s32.totalorder %v983_v32, 0  ;;  %v1087_v39 = vadd.s32 1, %v2738_v33 }
 0x10a   : > { %v1191_v31 = vadd.s32 1, %v2742_v26  ;;  %v2746_v38 = vadd.s32 4294967169, %v1289_v30  ;;  %v3271_v45 = vand.u32 31, %v3263_v36  ;;  %v3273_v46 = vsel %vm880_vm5, %v879_v29, 0 }
 0x10b   : > { %v1399_v41 = vadd.s32 1, %v2750_v34  ;;  %v3275_v47 = vshrl.u32 %v777_v37, 5  ;;  %v3277_v48 = vmul.f32 %v2896_v4, %v1501_v28  ;;  %v3279_v49 = vand.u32 31, %v777_v37 }
 0x10c   : > { %vm1192_vm4 = vcmp.gt.s32.totalorder %v1191_v31, 0  ;;  %v3281_v50 = vsel %vm984_vm6, %v983_v32, 0  ;;  %v1295_v57 = vadd.s32 1, %v2746_v38  ;;  %v4242_v61 = vand.u32 2147483647, %v3250_v3 }
 0x10d   : > { %v1193_v35 = vsel %vm1192_vm4, %v1191_v31, 0  ;;  %vm1088_vm7 = vcmp.gt.s32.totalorder %v1087_v39, 0  ;;  %vm1400_vm8 = vcmp.gt.s32.totalorder %v1399_v41, 0  ;;  %v3284_v54 = vmul.f32 %v2892_v62, %v1501_v28 }
 0x10e   : > { %v1195_v40 = vand.u32 31, %v1193_v35  ;;  %v1194_v2 = vshrl.u32 %v1193_v35, 5  ;;  %v3288_v5 = vmul.f32 %v2894_v63, %v1501_v28  ;;  %v3291_v4 = vadd.f32 %v3286_v60, %v1507_v43 }
 0x10f   : > { %v4243_v6 = vmov 683565275   ;;  %v1188_v12 = vand.u32 8388607, %v4242_v61  ;;  %v4253_v13 = vmov 2475754826  }
 0x110   : > { %v1196_v1 = vsub.s32 32, %v1195_v40  ;;  %v1198_v10 = vshll.u32 %v4243_v6, %v1195_v40  ;;  %v1201_v62 = vshll.u32 %v4253_v13, %v1195_v40  ;;  %v4248_v16 = vmov 2131351028  }
 0x111   : > { %v3300_v63 = vsel %vm1088_vm7, %v1087_v39, 0  ;;  %v1401_v18 = vsel %vm1400_vm8, %v1399_v41, 0  ;;  %v1204_v19 = vshll.u32 %v4248_v16, %v1195_v40  ;;  %v4246_v20 = vmov 2102212464  }
 0x112   : > { %v1199_v15 = vshrl.u32 %v4253_v13, %v1196_v1  ;;  %v1202_v17 = vshrl.u32 %v4248_v16, %v1196_v1  ;;  %v1205_v21 = vshrl.u32 %v4246_v20, %v1196_v1  ;;  %vm1296_vm9 = vcmp.gt.s32.totalorder %v1295_v57, 0 }
 0x113   : > { %v1207_v24 = vshll.u32 %v4246_v20, %v1195_v40  ;;  %v3015_v26 = vmov 920167782   ;;  %v4250_v29 = vmov 1326507024   ;;  %v1403_v31 = vand.u32 31, %v1401_v18 }
 0x114   : > { %v1200_v22 = vor.u32 %v1199_v15, %v1198_v10  ;;  %v1203_v23 = vor.u32 %v1202_v17, %v1201_v62  ;;  %v1206_v25 = vor.u32 %v1205_v21, %v1204_v19  ;;  %v1208_v27 = vshrl.u32 %v3015_v26, %v1196_v1 }
 0x115   : > { %v1210_v28 = vshll.u32 %v3015_v26, %v1195_v40  ;;  %v1211_v30 = vshrl.u32 %v4250_v29, %v1196_v1  ;;  %v1189_v32 = vor.u32 8388608, %v1188_v12  ;;  %v1197_v33 = vshrl.u32 %v4243_v6, %v1196_v1 }
 0x116   : > { %vm1216_vm10 = vcmp.lt.s32.totalorder %v1194_v2, 4  ;;  %v1209_v34 = vor.u32 %v1208_v27, %v1207_v24  ;;  %vm1213_vm11 = vcmp.lt.s32.totalorder %v1194_v2, 1  ;;  %vm1214_vm12 = vcmp.lt.s32.totalorder %v1194_v2, 2 }
 0x117   : > { %v1212_v35 = vor.u32 %v1211_v30, %v1210_v28  ;;  %v1218_v37 = vsel %vm1216_vm10, %v1206_v25, 2102212464  ;;  %vm1215_vm13 = vcmp.lt.s32.totalorder %v1194_v2, 3  ;;  %v1221_v38 = vsel %vm1213_vm11, %v1200_v22, %v1203_v23 }
 0x118   : > { %v1225_v39 = vsel %vm1213_vm11, %v1203_v23, %v1206_v25  ;;  %v1217_v41 = vsel %vm1213_vm11, %v1197_v33, %v1200_v22  ;;  %v1219_v43 = vsel %vm1215_vm13, %v1203_v23, %v1218_v37  ;;  %v1222_v10 = vsel %vm1216_vm10, %v1209_v34, 920167782 }
 0x119   : > { %v1226_v40 = vsel %vm1216_vm10, %v1212_v35, 1326507024  ;;  %v1223_v15 = vsel %vm1215_vm13, %v1206_v25, %v1222_v10  ;;  %v1229_v17 = vshll.u32 %v1189_v32, 8  ;;  %v4241_v12 = vand.u32 2147483647, %v3256_v11 }
 0x11a   : > { %v1227_v62 = vsel %vm1215_vm13, %v1209_v34, %v1226_v40  ;;  %v3312_v1 = vand.u32 31, %v3300_v63  ;;  %v1224_v19 = vsel %vm1214_vm12, %v1221_v38, %v1223_v15  ;;  %v1404_v24 = vsub.s32 32, %v1403_v31 }
 0x11b   : > { %v1228_v21 = vsel %vm1214_vm12, %v1225_v39, %v1227_v62  ;;  %v3319_v22 = vmul.u32.u64.low %v1229_v17, %v1224_v19  ;;  %v3320_v23 = vmul.u32.u64.high %v1229_v17, %v1224_v19, %v3319_v22  ;;  %v1297_v25 = vsel %vm1296_vm9, %v1295_v57, 0 }
 0x11c   : > { %v3316_v27 = vmul.u32.u64.low %v1229_v17, %v1228_v21  ;;  %v3317_v28 = vmul.u32.u64.high %v1229_v17, %v1228_v21, %v3316_v27  ;;  %v1402_v30 = vshrl.u32 %v1401_v18, 5  ;;  %v1220_v32 = vsel %vm1214_vm12, %v1217_v41, %v1219_v43 }
 0x11d   : > { %v1396_v33 = vand.u32 8388607, %v4241_v12  ;;  %v1406_v34 = vshll.u32 %v4243_v6, %v1403_v31  ;;  %v1407_v35 = vshrl.u32 %v4253_v13, %v1404_v24  ;;  %v1409_v37 = vshll.u32 %v4253_v13, %v1403_v31 }
 0x11e   : > { %v1410_v38 = vshrl.u32 %v4248_v16, %v1404_v24  ;;  %v1412_v39 = vshll.u32 %v4248_v16, %v1403_v31  ;;  %v1413_v10 = vshrl.u32 %v4246_v20, %v1404_v24  ;;  %v1415_v57 = vshll.u32 %v4246_v20, %v1403_v31 }
 0x11f   : > { %v1416_v2 = vshrl.u32 %v3015_v26, %v1404_v24  ;;  %v1236_v18 = vmul.u32 %v1229_v17, %v1220_v32  ;;  %vm1238_vm14 = vc.u32 %v3317_v28, %v3319_v22  ;;  %v1239_v41 = vadd.s32 1, %v3320_v23 }
 0x120   : > { %v1408_v43 = vor.u32 %v1407_v35, %v1406_v34  ;;  %v1405_v40 = vshrl.u32 %v4243_v6, %v1404_v24  ;;  %v1411_v15 = vor.u32 %v1410_v38, %v1409_v37  ;;  %v1414_v62 = vor.u32 %v1413_v10, %v1412_v39 }
 0x121   : > { %v1417_v19 = vor.u32 %v1416_v2, %v1415_v57  ;;  %v1240_v21 = vsel %vm1238_vm14, %v1239_v41, %v3320_v23  ;;  %v1397_v27 = vor.u32 8388608, %v1396_v33  ;;  %v1418_v0 = vshll.u32 %v3015_v26, %v1403_v31 }
 0x122   : > { %v1419_v12 = vshrl.u32 %v4250_v29, %v1404_v24  ;;  %v1241_v61 = vadd.s32 %v1240_v21, %v1236_v18  ;;  %vm1421_vm15 = vcmp.lt.s32.totalorder %v1402_v30, 1  ;;  %vm1423_vm2 = vcmp.lt.s32.totalorder %v1402_v30, 3 }
 0x123   : > { %vm1424_vm3 = vcmp.lt.s32.totalorder %v1402_v30, 4  ;;  %v1429_v34 = vsel %vm1421_vm15, %v1408_v43, %v1411_v15  ;;  %vm1422_vm4 = vcmp.lt.s32.totalorder %v1402_v30, 2  ;;  %v1433_v23 = vsel %vm1421_vm15, %v1411_v15, %v1414_v62 }
 0x124   : > { %v1420_v17 = vor.u32 %v1419_v12, %v1418_v0  ;;  %v1426_v32 = vsel %vm1424_vm3, %v1414_v62, 2102212464  ;;  %v1430_v35 = vsel %vm1424_vm3, %v1417_v19, 920167782  ;;  %v1242_v6 = vadd.s32 536870912, %v1241_v61 }
 0x125   : > { %v1431_v37 = vsel %vm1423_vm2, %v1414_v62, %v1430_v35  ;;  %v3345_v33 = vand.u32 31, %v1297_v25  ;;  %v1437_v38 = vshll.u32 %v1397_v27, 8  ;;  %v1425_v10 = vsel %vm1421_vm15, %v1405_v40, %v1408_v43 }
 0x126   : > { %v1432_v31 = vsel %vm1422_vm4, %v1429_v34, %v1431_v37  ;;  %v1434_v24 = vsel %vm1424_vm3, %v1420_v17, 1326507024  ;;  %v1243_v39 = vshrl.u32 %v1242_v6, 30  ;;  %v1427_v0 = vsel %vm1423_vm2, %v1411_v15, %v1426_v32 }
 0x127   : > { %v1435_v12 = vsel %vm1423_vm2, %v1417_v19, %v1434_v24  ;;  %v1537_v57 = vmul.f32 1.442695, %v3291_v4  ;;  %v3353_v18 = vmul.u32.u64.low %v1437_v38, %v1432_v31  ;;  %v3354_v41 = vmul.u32.u64.high %v1437_v38, %v1432_v31, %v3353_v18 }
 0x128   : > { %v1436_v2 = vsel %vm1422_vm4, %v1433_v23, %v1435_v12  ;;  %v3358_v62 = vshrl.u32 %v3281_v50, 5  ;;  %v1244_v21 = vshll.u32 %v1243_v39, 30  ;;  %v3364_v43 = vand.u32 31, %v3281_v50 }
 0x129   : > { %v3360_v27 = vmul.u32.u64.low %v1437_v38, %v1436_v2  ;;  %v3361_v6 = vmul.u32.u64.high %v1437_v38, %v1436_v2, %v3360_v27  ;;  %v1526_v40 = vadd.f32 %v3286_v60, %v3284_v54  ;;  %v3370_v4 = vadd.f32 %v3286_v60, %v3277_v48 }
 0x12a   : > { %v1428_v15 = vsel %vm1422_vm4, %v1425_v10, %v1427_v0  ;;  %v3374_v19 = vshrl.u32 %v3300_v63, 5  ;;  %v1092_v17 = vsub.s32 32, %v3312_v1  ;;  %v3377_v32 = vshrl.u32 %v1297_v25, 5 }
 0x12b   : > { %v3379_v34 = vsub.s32 %v1241_v61, %v1244_v21  ;;  %v3382_v50 = vsub.s32 32, %v3345_v33  ;;  %v3386_v54 = vadd.f32 %v3286_v60, %v3288_v5  ;;  %2897 = vpow2.f32 %v1537_v57 }
 0x12c   : > { %v1447_v48 = vadd.s32 1, %v3354_v41  ;;  %v1444_v63 = vmul.u32 %v1437_v38, %v1428_v15  ;;  %vm1446_vm5 = vc.u32 %v3361_v6, %v3353_v18  ;;  %v4245_v25 = vand.u32 2147483647, %v3253_v7 }
 0x12d   : > { %v1247_v30 = vsub.s32 0, %v3379_v34  ;;  %v3393_v61 = vmul.f32 1.442695, %v1526_v40  ;;  %vm1183_vm6 = vcmp.lt.s32.totalorder %v3250_v3, 0  ;;  %v1237_v35 = vadd.s32 %v3319_v22, %v3317_v28 }
 0x12e   : > { %v1448_v60 = vsel %vm1446_vm5, %v1447_v48, %v3354_v41  ;;  %v1267_v37 = vsub.s32 4, %v1243_v39  ;;  %v1101_v31 = vshrl.u32 %v4246_v20, %v1092_v17  ;;  %v1095_v24 = vshrl.u32 %v4253_v13, %v1092_v17 }
 0x12f   : > { %v2743_v5 = vmin.u32 %v1247_v30, %v3379_v34  ;;  %v1449_v23 = vadd.s32 %v1448_v60, %v1444_v63  ;;  %v1098_v38 = vshrl.u32 %v4248_v16, %v1092_v17  ;;  %v1103_v10 = vshll.u32 %v4246_v20, %v3312_v1 }
 0x130   : > { %v1104_v0 = vshrl.u32 %v3015_v26, %v1092_v17  ;;  %v1084_v28 = vand.u32 8388607, %v4245_v25  ;;  %v4264_v22 = vmov 683565275   ;;  %v1100_v2 = vshll.u32 %v4248_v16, %v3312_v1 }
 0x131   : > { %v1249_v12 = vclz %v2743_v5  ;;  %v1094_v57 = vshll.u32 %v4264_v22, %v3312_v1  ;;  %v1450_v41 = vadd.s32 536870912, %v1449_v23  ;;  %v1097_v21 = vshll.u32 %v4253_v13, %v3312_v1 }
 0x132   : > { %v1105_v27 = vor.u32 %v1104_v0, %v1103_v10  ;;  %v1107_v40 = vshrl.u32 %v4250_v29, %v1092_v17  ;;  %v1268_v48 = vsel %vm1183_vm6, %v1267_v37, %v1243_v39  ;;  %v1093_v30 = vshrl.u32 %v4264_v22, %v1092_v17 }
 0x133   : > { %v2744_v15 = vadd.s32 4294967294, %v1249_v12  ;;  %v1102_v63 = vor.u32 %v1101_v31, %v1100_v2  ;;  %v1451_v60 = vshrl.u32 %v1450_v41, 30  ;;  %v1096_v5 = vor.u32 %v1095_v24, %v1094_v57 }
 0x134   : > { %v1099_v25 = vor.u32 %v1098_v38, %v1097_v21  ;;  %v1106_v20 = vshll.u32 %v3015_v26, %v3312_v1  ;;  %v1085_v16 = vor.u32 8388608, %v1084_v28  ;;  %vm1109_vm8 = vcmp.lt.s32.totalorder %v3374_v19, 1 }
 0x135   : > { %vm2745_vm7 = vcmp.lt.s32.totalorder %v2744_v15, 0  ;;  %vm1112_vm9 = vcmp.lt.s32.totalorder %v3374_v19, 4  ;;  %v1452_v0 = vshll.u32 %v1451_v60, 30  ;;  %vm1110_vm10 = vcmp.lt.s32.totalorder %v3374_v19, 2 }
 0x136   : > { %v1252_v10 = vsel %vm2745_vm7, 0, %v2744_v15  ;;  %v1108_v12 = vor.u32 %v1107_v40, %v1106_v20  ;;  %v1118_v39 = vsel %vm1112_vm9, %v1105_v27, 920167782  ;;  %v1114_v31 = vsel %vm1112_vm9, %v1102_v63, 2102212464 }
 0x137   : > { %v1253_v17 = vsub.s32 32, %v1252_v10  ;;  %v1257_v37 = vsub.s32 4294967266, %v1252_v10  ;;  %v1254_v1 = vshll.u32 %v3379_v34, %v1252_v10  ;;  %v3428_v24 = vsub.s32 %v1449_v23, %v1452_v0 }
 0x138   : > { %vm1111_vm11 = vcmp.lt.s32.totalorder %v3374_v19, 3  ;;  %v1117_v38 = vsel %vm1109_vm8, %v1096_v5, %v1099_v25  ;;  %v3433_v20 = vpop.eup %2897  ;;  %v1121_v41 = vsel %vm1109_vm8, %v1099_v25, %v1102_v63  ;;  %v1113_v34 = vsel %vm1109_vm8, %v1093_v30, %v1096_v5 }
 0x139   : > { %v1255_v28 = vshrl.u32 %v1237_v35, %v1253_v17  ;;  %v1258_v57 = vadd.s32 127, %v1257_v37  ;;  %v1119_v2 = vsel %vm1111_vm11, %v1102_v63, %v1118_v39  ;;  %v1455_v21 = vsub.s32 0, %v3428_v24 }
 0x13a   : > { %v1115_v23 = vsel %vm1111_vm11, %v1099_v25, %v1114_v31  ;;  %v1122_v40 = vsel %vm1112_vm9, %v1108_v12, 1326507024  ;;  %v1125_v29 = vshll.u32 %v1085_v16, 8  ;;  %v4265_v35 = vand.u32 2147483647, %v3250_v3 }
 0x13b   : > { %v1256_v15 = vor.u32 %v1255_v28, %v1254_v1  ;;  %v1259_v10 = vshll.u32 %v1258_v57, 23  ;;  %v1123_v0 = vsel %vm1111_vm11, %v1105_v27, %v1122_v40  ;;  %v2751_v63 = vmin.u32 %v1455_v21, %v3428_v24 }
 0x13c   : > { %vm3444_vm12 = vcmp.le.f32.partialorder %v4265_v35, 0.7853982  ;;  %v1120_v17 = vsel %vm1110_vm10, %v1117_v38, %v1119_v2  ;;  %v1124_v25 = vsel %vm1110_vm10, %v1121_v41, %v1123_v0  ;;  %v1475_v5 = vsub.s32 4, %v1451_v60 }
 0x13d   : > { %v1260_v30 = vor.u32 4788187, %v1259_v10  ;;  %v3453_v12 = vmul.u32.u64.low %v1125_v29, %v1124_v25  ;;  %v3454_v37 = vmul.u32.u64.high %v1125_v29, %v1124_v25, %v3453_v12  ;;  %v3457_v16 = vmul.f32 1.442695, %v3386_v54 }
 0x13e   : > { %v1270_v27 = vsel %vm3444_vm12, 0, %v1268_v48  ;;  %v1457_v31 = vclz %v2751_v63  ;;  %v1116_v1 = vsel %vm1110_vm10, %v1113_v34, %v1115_v23  ;;  %v1263_v38 = vcvt.s32.f32 %v1256_v15 }
 0x13f   : > { %v1261_v28 = vand.u32 2147483647, %v1260_v30  ;;  %v3463_v57 = vmul.u32.u64.low %v1125_v29, %v1120_v17  ;;  %v3464_v2 = vmul.u32.u64.high %v1125_v29, %v1120_v17, %v3463_v57  ;;  %2899 = vpow2.f32 %v3393_v61 }
 0x140   : > { %vm1391_vm13 = vcmp.lt.s32.totalorder %v3256_v11, 0  ;;  %v2752_v41 = vadd.s32 4294967294, %v1457_v31  ;;  %v4255_v54 = vand.u32 2147483647, %v3258_v14  ;;  %v1274_v40 = vadd.s32 3, %v1270_v27 }
 0x141   : > { %v1264_v21 = vmul.f32 %v1263_v38, %v1261_v28  ;;  %v4268_v48 = vand.u32 2147483647, %v3256_v11  ;;  %v1445_v34 = vadd.s32 %v3353_v18, %v3361_v6  ;;  %v1476_v23 = vsel %vm1391_vm13, %v1475_v5, %v1451_v60 }
 0x142   : > { %vm2753_vm15 = vcmp.lt.s32.totalorder %v2752_v41, 0  ;;  %v1132_v61 = vmul.u32 %v1125_v29, %v1116_v1  ;;  %vm1134_vm2 = vc.u32 %v3454_v37, %v3463_v57  ;;  %v1303_v15 = vshrl.u32 %v4253_v13, %v3382_v50 }
 0x143   : > { %vm3472_vm14 = vcmp.le.f32.partialorder %v4268_v48, 0.7853982  ;;  %v1265_v10 = vxor.u32 2147483648, %v1264_v21  ;;  %v1460_v0 = vsel %vm2753_vm15, 0, %v2752_v41  ;;  %v1135_v35 = vadd.s32 1, %v3464_v2 }
 0x144   : > { %v4271_v63 = vmov 2131351028   ;;  %v1461_v25 = vsub.s32 32, %v1460_v0  ;;  %v1465_v18 = vsub.s32 4294967266, %v1460_v0  ;;  %v1292_v6 = vand.u32 8388607, %v4255_v54 }
 0x145   : > { %v1306_v17 = vshrl.u32 %v4271_v63, %v3382_v50  ;;  %v1302_v29 = vshll.u32 %v4264_v22, %v3345_v33  ;;  %v1266_v60 = vsel %vm1183_vm6, %v1265_v10, %v1264_v21  ;;  %v1462_v30 = vshll.u32 %v3428_v24, %v1460_v0 }
 0x146   : > { %v1136_v5 = vsel %vm1134_vm2, %v1135_v35, %v3464_v2  ;;  %v1305_v12 = vshll.u32 %v4253_v13, %v3345_v33  ;;  %v1269_v27 = vsel %vm3444_vm12, %v3250_v3, %v1266_v60  ;;  %v1463_v31 = vshrl.u32 %v1445_v34, %v1461_v25 }
 0x147   : > { %v1466_v1 = vadd.s32 127, %v1465_v18  ;;  %v1137_v28 = vadd.s32 %v1136_v5, %v1132_v61  ;;  %2901 = vcosq.f32 %v1269_v27  ;;  %v1304_v38 = vor.u32 %v1303_v15, %v1302_v29 }
 0x148   : > { %v1307_v41 = vor.u32 %v1306_v17, %v1305_v12  ;;  %v4272_v48 = vmov 2102212464   ;;  %2903 = vsinq.f32 %v1269_v27  ;;  %v1464_v24 = vor.u32 %v1463_v31, %v1462_v30 }
 0x149   : > { %v1309_v21 = vshrl.u32 %v4272_v48, %v3382_v50  ;;  %v1467_v10 = vshll.u32 %v1466_v1, 23  ;;  %v1138_v2 = vadd.s32 536870912, %v1137_v28  ;;  %v1308_v0 = vshll.u32 %v4271_v63, %v3345_v33 }
 0x14a   : > { %v1311_v39 = vshll.u32 %v4272_v48, %v3345_v33  ;;  %v1312_v34 = vshrl.u32 %v3015_v26, %v3382_v50  ;;  %v4273_v61 = vmov 1326507024   ;;  %v3510_v35 = vand.u32 3, %v1274_v40 }
 0x14b   : > { %v1315_v15 = vshrl.u32 %v4273_v61, %v3382_v50  ;;  %v1468_v17 = vor.u32 4788187, %v1467_v10  ;;  %v1478_v25 = vsel %vm3472_vm14, 0, %v1476_v23  ;;  %v1139_v18 = vshrl.u32 %v1138_v2, 30 }
 0x14c   : > { %v1471_v29 = vcvt.s32.f32 %v1464_v24  ;;  %v1310_v60 = vor.u32 %v1309_v21, %v1308_v0  ;;  %v1313_v30 = vor.u32 %v1312_v34, %v1311_v39  ;;  %v1314_v5 = vshll.u32 %v3015_v26, %v3345_v33  ;;  %v3518_v31 = vpop.eup %2899 }
 0x14d   : > { %v1469_v12 = vand.u32 2147483647, %v1468_v17  ;;  %v1140_v27 = vshll.u32 %v1139_v18, 30  ;;  %vm1317_vm3 = vcmp.lt.s32.totalorder %v3377_v32, 1  ;;  %vm1320_vm4 = vcmp.lt.s32.totalorder %v3377_v32, 4 }
 0x14e   : > { %v1293_v40 = vor.u32 8388608, %v1292_v6  ;;  %v1316_v1 = vor.u32 %v1315_v15, %v1314_v5  ;;  %v1325_v23 = vsel %vm1317_vm3, %v1304_v38, %v1307_v41  ;;  %v1326_v21 = vsel %vm1320_vm4, %v1313_v30, 920167782 }
 0x14f   : > { %2905 = vpow2.f32 %v3457_v16  ;;  %v1472_v24 = vmul.f32 %v1471_v29, %v1469_v12  ;;  %v3525_v33 = vsub.s32 %v1137_v28, %v1140_v27  ;;  %vm1319_vm5 = vcmp.lt.s32.totalorder %v3377_v32, 3 }
 0x150   : > { %v1482_v10 = vadd.s32 3, %v1478_v25  ;;  %vm1079_vm6 = vcmp.lt.s32.totalorder %v3253_v7, 0  ;;  %vm1318_vm7 = vcmp.lt.s32.totalorder %v3377_v32, 2  ;;  %v1327_v6 = vsel %vm1319_vm5, %v1310_v60, %v1326_v21 }
 0x151   : > { %vm1276_vm8 = vcmp.lt.s32.totalorder %v3510_v35, 2  ;;  %v1473_v2 = vxor.u32 2147483648, %v1472_v24  ;;  %v4274_v0 = vand.u32 2147483647, %v3253_v7  ;;  %v1143_v28 = vsub.s32 0, %v3525_v33 }
 0x152   : > { %v1328_v39 = vsel %vm1318_vm7, %v1325_v23, %v1327_v6  ;;  %v1329_v34 = vsel %vm1317_vm3, %v1307_v41, %v1310_v60  ;;  %vm1273_vm10 = vweird.f32 %v3250_v3  ;;  %v1163_v15 = vsub.s32 4, %v1139_v18 }
 0x153   : > { %vm3535_vm9 = vcmp.le.f32.partialorder %v4274_v0, 0.7853982  ;;  %v1322_v17 = vsel %vm1320_vm4, %v1310_v60, 2102212464  ;;  %v1330_v25 = vsel %vm1320_vm4, %v1316_v1, 1326507024  ;;  %v1474_v5 = vsel %vm1391_vm13, %v1473_v2, %v1472_v24 }
 0x154   : > { %v1333_v29 = vshll.u32 %v1293_v40, 8  ;;  %v2739_v12 = vmin.u32 %v1143_v28, %v3525_v33  ;;  %v1301_v27 = vshrl.u32 %v4264_v22, %v3382_v50  ;;  %v1331_v23 = vsel %vm1319_vm5, %v1313_v30, %v1330_v25  ;;  %v2902_v24 = vpop.eup %2901 }
 0x155   : > { %v1477_v21 = vsel %vm3472_vm14, %v3256_v11, %v1474_v5  ;;  %v1332_v60 = vsel %vm1318_vm7, %v1329_v34, %v1331_v23  ;;  %v1323_v30 = vsel %vm1319_vm5, %v1307_v41, %v1322_v17  ;;  %v2904_v2 = vpop.eup %2903  ;;  %vm1280_vm11 = vcmp.eq.s32.totalorder %v3510_v35, 2 }
 0x156   : > { %v3561_v1 = vmul.u32.u64.low %v1333_v29, %v1328_v39  ;;  %v3562_v40 = vmul.u32.u64.high %v1333_v29, %v1328_v39, %v3561_v1  ;;  %2907 = vcosq.f32 %v1477_v21  ;;  %v1145_v6 = vclz %v2739_v12 }
 0x157   : > { %v1321_v50 = vsel %vm1317_vm3, %v1301_v27, %v1304_v38  ;;  %v1281_v19 = vxor.u32 2147483648, %v2902_v24  ;;  %2909 = vsinq.f32 %v1477_v21  ;;  %v1164_v0 = vsel %vm1079_vm6, %v1163_v15, %v1139_v18 }
 0x158   : > { %v1278_v28 = vxor.u32 2147483648, %v2904_v2  ;;  %v2740_v39 = vadd.s32 4294967294, %v1145_v6  ;;  %v3572_v34 = vmul.u32.u64.low %v1333_v29, %v1332_v60  ;;  %v3573_v25 = vmul.u32.u64.high %v1333_v29, %v1332_v60, %v3572_v34 }
 0x159   : > { %vm1277_vm12 = vcmp.eq.s32.totalorder %v3510_v35, 0  ;;  %v1282_v5 = vsel %vm1280_vm11, %v1281_v19, %v2904_v2  ;;  %v1324_v38 = vsel %vm1318_vm7, %v1321_v50, %v1323_v30  ;;  %v4252_v41 = vand.u32 2147483647, %v3243_v58 }
 0x15a   : > { %v1279_v17 = vsel %vm1277_vm12, %v2902_v24, %v1278_v28  ;;  %v3579_v12 = vand.u32 3, %v1482_v10  ;;  %vm2741_vm13 = vcmp.lt.s32.totalorder %v2740_v39, 0  ;;  %v1343_v27 = vadd.s32 1, %v3562_v40 }
 0x15b   : > { %v1283_v18 = vsel %vm1276_vm8, %v1279_v17, %v1282_v5  ;;  %v1133_v15 = vadd.s32 %v3463_v57, %v3454_v37  ;;  %v1148_v23 = vsel %vm2741_vm13, 0, %v2740_v39  ;;  %v1166_v21 = vsel %vm3535_vm9, 0, %v1164_v0 }
 0x15c   : > { %v1284_v32 = vsel %vm1273_vm10, nan, %v1283_v18  ;;  %v1149_v60 = vsub.s32 32, %v1148_v23  ;;  %v1153_v24 = vsub.s32 4294967266, %v1148_v23  ;;  %v1340_v10 = vmul.u32 %v1333_v29, %v1324_v38  ;;  %v2906_v6 = vpop.eup %2905 }
 0x15d   : > { %v1550_v50 = vmul.f32 %v3518_v31, %v1284_v32  ;;  %vm1342_vm14 = vc.u32 %v3573_v25, %v3561_v1  ;;  %v3595_v35 = vand.u32 8388607, %v4252_v41  ;;  %v780_v37 = vsub.s32 32, %v3279_v49 }
 0x15e   : > { %v1150_v57 = vshll.u32 %v3525_v33, %v1148_v23  ;;  %v1151_v30 = vshrl.u32 %v1133_v15, %v1149_v60  ;;  %v1154_v3 = vadd.s32 127, %v1153_v24  ;;  %v1344_v2 = vsel %vm1342_vm14, %v1343_v27, %v3562_v40 }
 0x15f   : > { %1622 = vmatprep.subr.mxu0 %v1550_v50  ;;  %vm1484_vm15 = vcmp.lt.s32.totalorder %v3579_v12, 2  ;;  %vm1485_vm2 = vcmp.eq.s32.totalorder %v3579_v12, 0  ;;  %vm1488_vm3 = vcmp.eq.s32.totalorder %v3579_v12, 2  ;;  %v1345_v31 = vadd.s32 %v1344_v2, %v1340_v10 }
 0x160   : > { %vm1481_vm4 = vweird.f32 %v3256_v11  ;;  %v1152_v29 = vor.u32 %v1151_v30, %v1150_v57  ;;  %v1155_v19 = vshll.u32 %v1154_v3, 23  ;;  %v1170_v0 = vadd.s32 3, %v1166_v21 }
 0x161   : > { %v782_v33 = vshll.u32 %v4264_v22, %v3279_v49  ;;  %v1346_v28 = vadd.s32 536870912, %v1345_v31  ;;  %v783_v39 = vshrl.u32 %v4253_v13, %v780_v37  ;;  %v785_v40 = vshll.u32 %v4253_v13, %v3279_v49 }
 0x162   : > { %v786_v34 = vshrl.u32 %v4271_v63, %v780_v37  ;;  %v1156_v5 = vor.u32 4788187, %v1155_v19  ;;  %v773_v38 = vor.u32 8388608, %v3595_v35  ;;  %v781_v17 = vshrl.u32 %v4264_v22, %v780_v37 }
 0x163   : > { %v792_v27 = vshrl.u32 %v3015_v26, %v780_v37  ;;  %v2908_v18 = vpop.eup %2907  ;;  %v1347_v15 = vshrl.u32 %v1346_v28, 30  ;;  %v788_v23 = vshll.u32 %v4271_v63, %v3279_v49  ;;  %v789_v21 = vshrl.u32 %v4272_v48, %v780_v37 }
 0x164   : > { %v791_v32 = vshll.u32 %v4272_v48, %v3279_v49  ;;  %v2910_v60 = vpop.eup %2909  ;;  %v1489_v24 = vxor.u32 2147483648, %v2908_v18  ;;  %v1157_v10 = vand.u32 2147483647, %v1156_v5  ;;  %v1159_v50 = vcvt.s32.f32 %v1152_v29 }
 0x165   : > { %v795_v35 = vshrl.u32 %v4273_v61, %v780_v37  ;;  %v1486_v57 = vxor.u32 2147483648, %v2910_v60  ;;  %v1348_v30 = vshll.u32 %v1347_v15, 30  ;;  %v784_v3 = vor.u32 %v783_v39, %v782_v33 }
 0x166   : > { %v787_v2 = vor.u32 %v786_v34, %v785_v40  ;;  %v1490_v19 = vsel %vm1488_vm3, %v1489_v24, %v2910_v60  ;;  %v1160_v28 = vmul.f32 %v1159_v50, %v1157_v10  ;;  %v793_v41 = vor.u32 %v792_v27, %v791_v32 }
 0x167   : > { %v794_v13 = vshll.u32 %v3015_v26, %v3279_v49  ;;  %v1487_v54 = vsel %vm1485_vm2, %v2908_v18, %v1486_v57  ;;  %v3625_v9 = vsub.s32 %v1345_v31, %v1348_v30  ;;  %v790_v29 = vor.u32 %v789_v21, %v788_v23 }
 0x168   : > { %vm797_vm5 = vcmp.lt.s32.totalorder %v3275_v47, 1  ;;  %v1491_v37 = vsel %vm1484_vm15, %v1487_v54, %v1490_v19  ;;  %v1161_v33 = vxor.u32 2147483648, %v1160_v28  ;;  %vm799_vm7 = vcmp.lt.s32.totalorder %v3275_v47, 3 }
 0x169   : > { %v796_v39 = vor.u32 %v795_v35, %v794_v13  ;;  %v1492_v40 = vsel %vm1481_vm4, nan, %v1491_v37  ;;  %v1351_v49 = vsub.s32 0, %v3625_v9  ;;  %v1371_v34 = vsub.s32 4, %v1347_v15 }
 0x16a   : > { %vm800_vm8 = vcmp.lt.s32.totalorder %v3275_v47, 4  ;;  %v1552_v31 = vmul.f32 %v2906_v6, %v1492_v40  ;;  %v1162_v5 = vsel %vm1079_vm6, %v1161_v33, %v1160_v28  ;;  %v805_v12 = vsel %vm797_vm5, %v784_v3, %v787_v2 }
 0x16b   : > { %v806_v54 = vsel %vm800_vm8, %v793_v41, 920167782  ;;  %v1165_v13 = vsel %vm3535_vm9, %v3253_v7, %v1162_v5  ;;  %v2747_v11 = vmin.u32 %v1351_v49, %v3625_v9  ;;  %v802_v27 = vsel %vm800_vm8, %v790_v29, 2102212464 }
 0x16c   : > { %v807_v18 = vsel %vm799_vm7, %v790_v29, %v806_v54  ;;  %1711 = vmatprep.subr.mxu1 %v1552_v31  ;;  %2911 = vcosq.f32 %v1165_v13  ;;  %vm798_vm10 = vcmp.lt.s32.totalorder %v3275_v47, 2  ;;  %v809_v6 = vsel %vm797_vm5, %v787_v2, %v790_v29 }
 0x16d   : > { %v810_v23 = vsel %vm800_vm8, %v796_v39, 1326507024  ;;  %2913 = vsinq.f32 %v1165_v13  ;;  %vm1287_vm6 = vcmp.lt.s32.totalorder %v3258_v14, 0  ;;  %v1353_v21 = vclz %v2747_v11 }
 0x16e   : > { %v808_v16 = vsel %vm798_vm10, %v805_v12, %v807_v18  ;;  %v801_v32 = vsel %vm797_vm5, %v781_v17, %v784_v3  ;;  %v803_v60 = vsel %vm799_vm7, %v787_v2, %v802_v27  ;;  %v811_v24 = vsel %vm799_vm7, %v793_v41, %v810_v23  ;;  %v3673_v41 = vpop.permute.xlu1 %1513 }
 0x16f   : > { %v813_v10 = vshll.u32 %v773_v38, 8  ;;  %v3657_v50 = vand.u32 3, %v1170_v0  ;;  %v2748_v35 = vadd.s32 4294967294, %v1353_v21  ;;  %v1372_v57 = vsel %vm1287_vm6, %v1371_v34, %v1347_v15 }
 0x170   : > { %v812_v30 = vsel %vm798_vm10, %v809_v6, %v811_v24  ;;  %v3671_v2 = vmul.f32 1.442695, %v3370_v4  ;;  %v804_v0 = vsel %vm798_vm10, %v801_v32, %v803_v60  ;;  %v973_v38 = vand.u32 2147483647, %v3246_v59 }
 0x171   : > { %v3663_v19 = vmul.u32.u64.low %v813_v10, %v812_v30  ;;  %v3664_v28 = vmul.u32.u64.high %v813_v10, %v812_v30, %v3663_v19  ;;  %v3666_v17 = vmul.u32.u64.low %v813_v10, %v808_v16  ;;  %v3667_v3 = vmul.u32.u64.high %v813_v10, %v808_v16, %v3666_v17 }
 0x172   : > { %vm2749_vm9 = vcmp.lt.s32.totalorder %v2748_v35, 0  ;;  %v3680_v15 = vadd.f32 %v3673_v41, %v3268_v44  ;;  %v4277_v29 = vand.u32 2147483647, %v3258_v14  ;;  %v988_v33 = vsub.s32 32, %v3364_v43 }
 0x173   : > { %v1356_v4 = vsel %vm2749_vm9, 0, %v2748_v35  ;;  %v1341_v39 = vadd.s32 %v3561_v1, %v3573_v25  ;;  %vm1173_vm12 = vcmp.eq.s32.totalorder %v3657_v50, 0  ;;  %vm1176_vm13 = vcmp.eq.s32.totalorder %v3657_v50, 2 }
 0x174   : > { %vm3684_vm11 = vcmp.le.f32.partialorder %v4277_v29, 0.7853982  ;;  %v1357_v47 = vsub.s32 32, %v1356_v4  ;;  %v1361_v40 = vsub.s32 4294967266, %v1356_v4  ;;  %v820_v44 = vmul.u32 %v813_v10, %v804_v0 }
 0x175   : > { %v1374_v49 = vsel %vm3684_vm11, 0, %v1372_v57  ;;  %vm822_vm14 = vc.u32 %v3664_v28, %v3666_v17  ;;  %v823_v34 = vadd.s32 1, %v3667_v3  ;;  %vm1172_vm15 = vcmp.lt.s32.totalorder %v3657_v50, 2 }
 0x176   : > { %v1358_v31 = vshll.u32 %v3625_v9, %v1356_v4  ;;  %v1359_v1 = vshrl.u32 %v1341_v39, %v1357_v47  ;;  %v1362_v25 = vadd.s32 127, %v1361_v40  ;;  %v3702_v5 = vand.u32 8388607, %v973_v38 }
 0x177   : > { %vm1169_vm2 = vweird.f32 %v3253_v7  ;;  %v3705_v12 = vadd.s32 3, %v1374_v49  ;;  %v824_v54 = vsel %vm822_vm14, %v823_v34, %v3667_v3  ;;  %v990_v13 = vshll.u32 %v4264_v22, %v3364_v43 }
 0x178   : > { %v4280_v11 = vmov 2475754826   ;;  %v1360_v18 = vor.u32 %v1359_v1, %v1358_v31  ;;  %v1363_v6 = vshll.u32 %v1362_v25, 23  ;;  %v825_v9 = vadd.s32 %v824_v54, %v820_v44 }
 0x179   : > { %v991_v27 = vshrl.u32 %v4280_v11, %v988_v33  ;;  %v993_v23 = vshll.u32 %v4280_v11, %v3364_v43  ;;  %v994_v21 = vshrl.u32 %v4271_v63, %v988_v33  ;;  %v997_v16 = vshrl.u32 %v4272_v48, %v988_v33  ;;  %v2912_v24 = vpop.eup %2911 }
 0x17a   : > { %v999_v32 = vshll.u32 %v4272_v48, %v3364_v43  ;;  %v1000_v60 = vshrl.u32 %v3015_v26, %v988_v33  ;;  %v1364_v10 = vor.u32 4788187, %v1363_v6  ;;  %v826_v35 = vadd.s32 536870912, %v825_v9  ;;  %v2914_v19 = vpop.eup %2913 }
 0x17b   : > { %v981_v57 = vor.u32 8388608, %v3702_v5  ;;  %v996_v30 = vshll.u32 %v4271_v63, %v3364_v43  ;;  %v1177_v3 = vxor.u32 2147483648, %v2912_v24  ;;  %v992_v0 = vor.u32 %v991_v27, %v990_v13 }
 0x17c   : > { %v1001_v29 = vor.u32 %v1000_v60, %v999_v32  ;;  %v1003_v4 = vshrl.u32 %v4273_v61, %v988_v33  ;;  %v1174_v39 = vxor.u32 2147483648, %v2914_v19  ;;  %v1365_v47 = vand.u32 2147483647, %v1364_v10 }
 0x17d   : > { %v1367_v40 = vcvt.s32.f32 %v1360_v18  ;;  %v827_v49 = vshrl.u32 %v826_v35, 30  ;;  %v1178_v44 = vsel %vm1176_vm13, %v1177_v3, %v2914_v19  ;;  %v995_v34 = vor.u32 %v994_v21, %v993_v23 }
 0x17e   : > { %v998_v31 = vor.u32 %v997_v16, %v996_v30  ;;  %v1002_v1 = vshll.u32 %v3015_v26, %v3364_v43  ;;  %v1175_v25 = vsel %vm1173_vm12, %v2912_v24, %v1174_v39  ;;  %vm1008_vm3 = vcmp.lt.s32.totalorder %v3358_v62, 4 }
 0x17f   : > { %v1368_v5 = vmul.f32 %v1367_v40, %v1365_v47  ;;  %v828_v54 = vshll.u32 %v827_v49, 30  ;;  %v1179_v13 = vsel %vm1172_vm15, %v1175_v25, %v1178_v44  ;;  %vm1005_vm4 = vcmp.lt.s32.totalorder %v3358_v62, 1 }
 0x180   : > { %v1004_v27 = vor.u32 %v1003_v4, %v1002_v1  ;;  %v1014_v18 = vsel %vm1008_vm3, %v1001_v29, 920167782  ;;  %v1180_v6 = vsel %vm1169_vm2, nan, %v1179_v13  ;;  %vm1007_vm5 = vcmp.lt.s32.totalorder %v3358_v62, 3 }
 0x181   : > { %v1369_v43 = vxor.u32 2147483648, %v1368_v5  ;;  %v3736_v23 = vsub.s32 %v825_v9, %v828_v54  ;;  %v1549_v21 = vmul.f32 %v3433_v20, %v1180_v6  ;;  %v989_v16 = vshrl.u32 %v4264_v22, %v988_v33 }
 0x182   : > { %v1013_v50 = vsel %vm1005_vm4, %v992_v0, %v995_v34  ;;  %v1015_v32 = vsel %vm1007_vm5, %v998_v31, %v1014_v18  ;;  %v851_v24 = vsub.s32 4, %v827_v49  ;;  %vm1006_vm7 = vcmp.lt.s32.totalorder %v3358_v62, 2 }
 0x183   : > { %v1370_v60 = vsel %vm1287_vm6, %v1369_v43, %v1368_v5  ;;  %v831_v7 = vsub.s32 0, %v3736_v23  ;;  %1623 = vmatpush1.msra.mxu0 %v1549_v21  ;;  %v1010_v33 = vsel %vm1008_vm3, %v998_v31, 2102212464  ;;  %v1017_v9 = vsel %vm1005_vm4, %v995_v34, %v998_v31 }
 0x184   : > { %v1373_v20 = vsel %vm3684_vm11, %v3258_v14, %v1370_v60  ;;  %v1018_v10 = vsel %vm1008_vm3, %v1004_v27, 1326507024  ;;  %v1016_v30 = vsel %vm1006_vm7, %v1013_v50, %v1015_v32  ;;  %vm767_vm8 = vcmp.lt.s32.totalorder %v3243_v58, 0 }
 0x185   : > { %2915 = vcosq.f32 %v1373_v20  ;;  %v2727_v35 = vmin.u32 %v831_v7, %v3736_v23  ;;  %v1019_v19 = vsel %vm1007_vm5, %v1001_v29, %v1018_v10  ;;  %v1021_v3 = vshll.u32 %v981_v57, 8 }
 0x186   : > { %2917 = vsinq.f32 %v1373_v20  ;;  %v1020_v37 = vsel %vm1006_vm7, %v1017_v9, %v1019_v19  ;;  %v3767_v4 = vand.u32 3, %v3705_v12  ;;  %v1009_v47 = vsel %vm1005_vm4, %v989_v16, %v992_v0 }
 0x187   : > { %v833_v39 = vclz %v2727_v35  ;;  %v1011_v40 = vsel %vm1007_vm5, %v995_v34, %v1010_v33  ;;  %v3773_v44 = vmul.u32.u64.low %v1021_v3, %v1020_v37  ;;  %v3774_v31 = vmul.u32.u64.high %v1021_v3, %v1020_v37, %v3773_v44 }
 0x188   : > { %v3776_v29 = vmul.u32.u64.low %v1021_v3, %v1016_v30  ;;  %v3777_v1 = vmul.u32.u64.high %v1021_v3, %v1016_v30, %v3776_v29  ;;  %v3781_v25 = vshrl.u32 %v3263_v36, 5  ;;  %v3785_v12 = vmul.f32 %v3240_v56, %v3265_v42 }
 0x189   : > { %v2728_v57 = vadd.s32 4294967294, %v833_v39  ;;  %v852_v0 = vsel %vm767_vm8, %v851_v24, %v827_v49  ;;  %v3790_v34 = vsub.s32 32, %v3271_v45  ;;  %v3793_v5 = vand.u32 31, %v3273_v46 }
 0x18a   : > { %2919 = vpow2.f32 %v3671_v2  ;;  %v1012_v36 = vsel %vm1006_vm7, %v1009_v47, %v1011_v40  ;;  %v3799_v54 = vmul.f32 1.442695, %v3680_v15  ;;  %v4281_v56 = vand.u32 2147483647, %v3243_v58 }
 0x18b   : > { %v821_v49 = vadd.s32 %v3666_v17, %v3664_v28  ;;  %vm2729_vm6 = vcmp.lt.s32.totalorder %v2728_v57, 0  ;;  %vm1384_vm9 = vcmp.eq.s32.totalorder %v3767_v4, 2  ;;  %vm1030_vm11 = vc.u32 %v3774_v31, %v3776_v29 }
 0x18c   : > { %vm3803_vm10 = vcmp.le.f32.partialorder %v4281_v56, 0.7853982  ;;  %v836_v27 = vsel %vm2729_vm6, 0, %v2728_v57  ;;  %v1031_v2 = vadd.s32 1, %v3777_v1  ;;  %vm1381_vm12 = vcmp.eq.s32.totalorder %v3767_v4, 0 }
 0x18d   : > { %v854_v62 = vsel %vm3803_vm10, 0, %v852_v0  ;;  %v837_v15 = vsub.s32 32, %v836_v27  ;;  %v841_v18 = vsub.s32 4294967266, %v836_v27  ;;  %v1028_v6 = vmul.u32 %v1021_v3, %v1012_v36 }
 0x18e   : > { %v661_v43 = vand.u32 2147483647, %v3235_v53  ;;  %vm1380_vm13 = vcmp.lt.s32.totalorder %v3767_v4, 2  ;;  %v1032_v28 = vsel %vm1030_vm11, %v1031_v2, %v3777_v1  ;;  %v678_v17 = vshll.u32 %v4264_v22, %v3271_v45 }
 0x18f   : > { %v679_v21 = vshrl.u32 %v4280_v11, %v3790_v34  ;;  %v682_v16 = vshrl.u32 %v4271_v63, %v3790_v34  ;;  %vm1377_vm14 = vweird.f32 %v3258_v14  ;;  %v838_v50 = vshll.u32 %v3736_v23, %v836_v27 }
 0x190   : > { %v839_v32 = vshrl.u32 %v821_v49, %v837_v15  ;;  %v842_v60 = vadd.s32 127, %v841_v18  ;;  %v1033_v7 = vadd.s32 %v1032_v28, %v1028_v6  ;;  %v681_v24 = vshll.u32 %v4280_v11, %v3271_v45 }
 0x191   : > { %v685_v20 = vshrl.u32 %v4272_v48, %v3790_v34  ;;  %v687_v33 = vshll.u32 %v4272_v48, %v3271_v45  ;;  %v688_v9 = vshrl.u32 %v3015_v26, %v3790_v34  ;;  %v668_v23 = vand.u32 8388607, %v661_v43 }
 0x192   : > { %v840_v10 = vor.u32 %v839_v32, %v838_v50  ;;  %v843_v35 = vshll.u32 %v842_v60, 23  ;;  %v1034_v30 = vadd.s32 536870912, %v1033_v7  ;;  %v2916_v19 = vpop.eup %2915  ;;  %v680_v37 = vor.u32 %v679_v21, %v678_v17 }
 0x193   : > { %v684_v3 = vshll.u32 %v4271_v63, %v3271_v45  ;;  %v689_v39 = vor.u32 %v688_v9, %v687_v33  ;;  %v691_v47 = vshrl.u32 %v4273_v61, %v3790_v34  ;;  %v2918_v40 = vpop.eup %2917  ;;  %v1385_v44 = vxor.u32 2147483648, %v2916_v19 }
 0x194   : > { %v844_v1 = vor.u32 4788187, %v843_v35  ;;  %v3841_v57 = vshrl.u32 %v1034_v30, 30  ;;  %v683_v0 = vor.u32 %v682_v16, %v681_v24  ;;  %v1382_v36 = vxor.u32 2147483648, %v2918_v40 }
 0x195   : > { %v847_v56 = vcvt.s32.f32 %v840_v10  ;;  %v686_v49 = vor.u32 %v685_v20, %v684_v3  ;;  %v690_v27 = vshll.u32 %v3015_v26, %v3271_v45  ;;  %v1386_v2 = vsel %vm1384_vm9, %v1385_v44, %v2918_v40 }
 0x196   : > { %v845_v15 = vand.u32 2147483647, %v844_v1  ;;  %v1036_v18 = vshll.u32 %v3841_v57, 30  ;;  %vm696_vm15 = vcmp.lt.s32.totalorder %v3781_v25, 4  ;;  %v1383_v6 = vsel %vm1381_vm12, %v2916_v19, %v1382_v36 }
 0x197   : > { %v858_v28 = vadd.s32 3, %v854_v62  ;;  %v692_v17 = vor.u32 %v691_v47, %v690_v27  ;;  %v702_v21 = vsel %vm696_vm15, %v689_v39, 920167782  ;;  %v2920_v16 = vpop.eup %2919  ;;  %v1387_v45 = vsel %vm1380_vm13, %v1383_v6, %v1386_v2 }
 0x198   : > { %v848_v50 = vmul.f32 %v847_v56, %v845_v15  ;;  %v3855_v32 = vsub.s32 %v1033_v7, %v1036_v18  ;;  %vm693_vm2 = vcmp.lt.s32.totalorder %v3781_v25, 1  ;;  %v1388_v60 = vsel %vm1377_vm14, nan, %v1387_v45 }
 0x199   : > { %v669_v24 = vor.u32 8388608, %v668_v23  ;;  %vm695_vm3 = vcmp.lt.s32.totalorder %v3781_v25, 3  ;;  %v701_v62 = vsel %vm693_vm2, %v680_v37, %v683_v0  ;;  %v1551_v20 = vmul.f32 %v2920_v16, %v1388_v60 }
 0x19a   : > { %v849_v33 = vxor.u32 2147483648, %v848_v50  ;;  %v1039_v9 = vsub.s32 0, %v3855_v32  ;;  %v703_v4 = vsel %vm695_vm3, %v686_v49, %v702_v21  ;;  %v677_v7 = vshrl.u32 %v4264_v22, %v3790_v34 }
 0x19b   : > { %v698_v14 = vsel %vm696_vm15, %v686_v49, 2102212464  ;;  %v705_v10 = vsel %vm693_vm2, %v683_v0, %v686_v49  ;;  %v706_v35 = vsel %vm696_vm15, %v692_v17, 1326507024  ;;  %1712 = vmatpush1.msra.mxu1 %v1551_v20  ;;  %vm694_vm4 = vcmp.lt.s32.totalorder %v3781_v25, 2 }
 0x19c   : > { %v850_v30 = vsel %vm767_vm8, %v849_v33, %v848_v50  ;;  %v2735_v23 = vmin.u32 %v1039_v9, %v3855_v32  ;;  %v707_v34 = vsel %vm695_vm3, %v689_v39, %v706_v35  ;;  %v704_v3 = vsel %vm694_vm4, %v701_v62, %v703_v4 }
 0x19d   : > { %v853_v19 = vsel %vm3803_vm10, %v3243_v58, %v850_v30  ;;  %v708_v47 = vsel %vm694_vm4, %v705_v10, %v707_v34  ;;  %v709_v40 = vshll.u32 %v669_v24, 8  ;;  %v697_v1 = vsel %vm693_vm2, %v677_v7, %v680_v37 }
 0x19e   : > { %2921 = vcosq.f32 %v853_v19  ;;  %v1041_v44 = vclz %v2735_v23  ;;  %v699_v36 = vsel %vm695_vm3, %v683_v0, %v698_v14  ;;  %v1059_v39 = vsub.s32 4, %v3841_v57 }
 0x19f   : > { %2923 = vsinq.f32 %v853_v19  ;;  %v3892_v13 = vmul.u32.u64.low %v709_v40, %v708_v47  ;;  %v3893_v56 = vmul.u32.u64.high %v709_v40, %v708_v47, %v3892_v13  ;;  %v3896_v49 = vshrl.u32 %v3273_v46, 5 }
 0x1a0   : > { %v2736_v27 = vadd.s32 4294967294, %v1041_v44  ;;  %v3898_v2 = vmul.u32.u64.low %v709_v40, %v704_v3  ;;  %v3899_v15 = vmul.u32.u64.high %v709_v40, %v704_v3, %v3898_v2  ;;  %v884_v18 = vsub.s32 32, %v3793_v5 }
 0x1a1   : > { %v3905_v37 = vadd.f32 %v3673_v41, %v3785_v12  ;;  %v3907_v0 = vand.u32 3, %v858_v28  ;;  %v700_v6 = vsel %vm694_vm4, %v697_v1, %v699_v36  ;;  %2925 = vpow2.f32 %v3799_v54 }
 0x1a2   : > { %vm975_vm5 = vcmp.lt.s32.totalorder %v3246_v59, 0  ;;  %vm2737_vm7 = vcmp.lt.s32.totalorder %v2736_v27, 0  ;;  %v869_v46 = vand.u32 2147483647, %v3238_v55  ;;  %v1029_v17 = vadd.s32 %v3776_v29, %v3774_v31 }
 0x1a3   : > { %v1044_v21 = vsel %vm2737_vm7, 0, %v2736_v27  ;;  %v3919_v12 = vsel %vm975_vm5, %v1059_v39, %v3841_v57  ;;  %vm718_vm8 = vc.u32 %v3893_v56, %v3898_v2  ;;  %v716_v54 = vmul.u32 %v709_v40, %v700_v6 }
 0x1a4   : > { %v1045_v25 = vsub.s32 32, %v1044_v21  ;;  %v1049_v28 = vsub.s32 4294967266, %v1044_v21  ;;  %v719_v16 = vadd.s32 1, %v3899_v15  ;;  %vm864_vm10 = vcmp.eq.s32.totalorder %v3907_v0, 2 }
 0x1a5   : > { %v1046_v45 = vshll.u32 %v3855_v32, %v1044_v21  ;;  %v885_v31 = vshrl.u32 %v4264_v22, %v884_v18  ;;  %v887_v29 = vshrl.u32 %v4280_v11, %v884_v18  ;;  %v890_v50 = vshrl.u32 %v4271_v63, %v884_v18 }
 0x1a6   : > { %vm861_vm6 = vcmp.eq.s32.totalorder %v3907_v0, 0  ;;  %v1047_v57 = vshrl.u32 %v1029_v17, %v1045_v25  ;;  %v1050_v60 = vadd.s32 127, %v1049_v28  ;;  %v720_v24 = vsel %vm718_vm8, %v719_v16, %v3899_v15 }
 0x1a7   : > { %v876_v62 = vand.u32 8388607, %v869_v46  ;;  %vm860_vm9 = vcmp.lt.s32.totalorder %v3907_v0, 2  ;;  %v721_v20 = vadd.s32 %v720_v24, %v716_v54  ;;  %v886_v32 = vshll.u32 %v4264_v22, %v3793_v5 }
 0x1a8   : > { %v893_v33 = vshrl.u32 %v4272_v48, %v884_v18  ;;  %v896_v9 = vshrl.u32 %v3015_v26, %v884_v18  ;;  %vm857_vm11 = vweird.f32 %v3243_v58  ;;  %v1048_v4 = vor.u32 %v1047_v57, %v1046_v45 }
 0x1a9   : > { %v1051_v7 = vshll.u32 %v1050_v60, 23  ;;  %v889_v14 = vshll.u32 %v4280_v11, %v3793_v5  ;;  %v895_v10 = vshll.u32 %v4272_v48, %v3793_v5  ;;  %v722_v35 = vadd.s32 536870912, %v721_v20 }
 0x1aa   : > { %v888_v30 = vor.u32 %v887_v29, %v886_v32  ;;  %v892_v23 = vshll.u32 %v4271_v63, %v3793_v5  ;;  %v899_v22 = vshrl.u32 %v4273_v61, %v884_v18  ;;  %vm3948_vm12 = vcmp.le.f32.partialorder %v973_v38, 0.7853982 }
 0x1ab   : > { %v1052_v19 = vor.u32 4788187, %v1051_v7  ;;  %v877_v3 = vor.u32 8388608, %v876_v62  ;;  %v891_v47 = vor.u32 %v890_v50, %v889_v14  ;;  %v897_v11 = vor.u32 %v896_v9, %v895_v10  ;;  %v2922_v40 = vpop.eup %2921 }
 0x1ac   : > { %v3952_v44 = vshrl.u32 %v722_v35, 30  ;;  %v894_v48 = vor.u32 %v893_v33, %v892_v23  ;;  %v898_v1 = vshll.u32 %v3015_v26, %v3793_v5  ;;  %vm901_vm13 = vcmp.lt.s32.totalorder %v3896_v49, 1  ;;  %v2924_v63 = vpop.eup %2923 }
 0x1ad   : > { %v865_v61 = vxor.u32 2147483648, %v2922_v40  ;;  %v1053_v36 = vand.u32 2147483647, %v1052_v19  ;;  %v1055_v38 = vcvt.s32.f32 %v1048_v4  ;;  %vm903_vm14 = vcmp.lt.s32.totalorder %v3896_v49, 3 }
 0x1ae   : > { %v862_v39 = vxor.u32 2147483648, %v2924_v63  ;;  %v724_v13 = vshll.u32 %v3952_v44, 30  ;;  %v900_v27 = vor.u32 %v899_v22, %v898_v1  ;;  %vm904_vm15 = vcmp.lt.s32.totalorder %v3896_v49, 4  ;;  %v2926_v6 = vpop.eup %2925 }
 0x1af   : > { %v866_v15 = vsel %vm864_vm10, %v865_v61, %v2924_v63  ;;  %v1056_v18 = vmul.f32 %v1055_v38, %v1053_v36  ;;  %v909_v26 = vsel %vm901_vm13, %v888_v30, %v891_v47  ;;  %v910_v5 = vsel %vm904_vm15, %v897_v11, 920167782 }
 0x1b0   : > { %v863_v17 = vsel %vm861_vm6, %v2922_v40, %v862_v39  ;;  %v725_v21 = vsub.s32 %v721_v20, %v724_v13  ;;  %vm902_vm2 = vcmp.lt.s32.totalorder %v3896_v49, 2  ;;  %v911_v25 = vsel %vm903_vm14, %v894_v48, %v910_v5 }
 0x1b1   : > { %v867_v28 = vsel %vm860_vm9, %v863_v17, %v866_v15  ;;  %v1057_v54 = vxor.u32 2147483648, %v1056_v18  ;;  %v905_v16 = vsel %vm901_vm13, %v885_v31, %v888_v30  ;;  %v906_v45 = vsel %vm904_vm15, %v894_v48, 2102212464 }
 0x1b2   : > { %v868_v29 = vsel %vm857_vm11, nan, %v867_v28  ;;  %v727_v50 = vsub.s32 0, %v725_v21  ;;  %v912_v57 = vsel %vm902_vm2, %v909_v26, %v911_v25  ;;  %v913_v60 = vsel %vm901_vm13, %v891_v47, %v894_v48 }
 0x1b3   : > { %v1546_v24 = vmul.f32 %v2926_v6, %v868_v29  ;;  %v1058_v0 = vsel %vm975_vm5, %v1057_v54, %v1056_v18  ;;  %v914_v31 = vsel %vm904_vm15, %v900_v27, 1326507024  ;;  %v917_v62 = vshll.u32 %v877_v3, 8 }
 0x1b4   : > { %v1061_v58 = vsel %vm3948_vm12, %v3246_v59, %v1058_v0  ;;  %v2723_v20 = vmin.u32 %v727_v50, %v725_v21  ;;  %v907_v32 = vsel %vm903_vm14, %v891_v47, %v906_v45  ;;  %v915_v33 = vsel %vm903_vm14, %v897_v11, %v914_v31 }
 0x1b5   : > { %1624 = vmatprep.subr.mxu0 %v1546_v24  ;;  %2927 = vcosq.f32 %v1061_v58  ;;  %v916_v9 = vsel %vm902_vm2, %v913_v60, %v915_v33  ;;  %v3996_v4 = vmul.u32.u64.low %v917_v62, %v912_v57  ;;  %v3997_v7 = vmul.u32.u64.high %v917_v62, %v912_v57, %v3996_v4 }
 0x1b6   : > { %v1535_v14 = vmul.f32 1.442695, %v3905_v37  ;;  %2929 = vsinq.f32 %v1061_v58  ;;  %v729_v10 = vclz %v2723_v20  ;;  %v1062_v23 = vsel %vm3948_vm12, 0, %v3919_v12 }
 0x1b7   : > { %v4001_v35 = vmul.u32.u64.low %v917_v62, %v916_v9  ;;  %v4002_v30 = vmul.u32.u64.high %v917_v62, %v916_v9, %v4001_v35  ;;  %v908_v19 = vsel %vm902_vm2, %v905_v16, %v907_v32  ;;  %v927_v3 = vadd.s32 1, %v3997_v7 }
 0x1b8   : > { %v2724_v22 = vadd.s32 4294967294, %v729_v10  ;;  %2931 = vpow2.f32 %v1535_v14  ;;  %v1066_v47 = vadd.s32 3, %v1062_v23  ;;  %v924_v37 = vmul.u32 %v917_v62, %v908_v19 }
 0x1b9   : > { %vm926_vm4 = vc.u32 %v4002_v30, %v3996_v4  ;;  %v717_v40 = vadd.s32 %v3898_v2, %v3893_v56  ;;  %v1503_v28 = vmul.f32 %v3230_v51, %v3265_v42  ;;  %vm1065_vm10 = vweird.f32 %v3246_v59 }
 0x1ba   : > { %vm2725_vm3 = vcmp.lt.s32.totalorder %v2724_v22, 0  ;;  %v928_v12 = vsel %vm926_vm4, %v927_v3, %v3997_v7  ;;  %v1067_v38 = vand.u32 3, %v1066_v47  ;;  %vm663_vm6 = vcmp.lt.s32.totalorder %v3235_v53, 0 }
 0x1bb   : > { %v732_v11 = vsel %vm2725_vm3, 0, %v2724_v22  ;;  %v929_v1 = vadd.s32 %v928_v12, %v924_v37  ;;  %v747_v0 = vsub.s32 4, %v3952_v44  ;;  %v1521_v62 = vadd.f32 %v3673_v41, %v1503_v28 }
 0x1bc   : > { %v733_v48 = vsub.s32 32, %v732_v11  ;;  %v737_v34 = vsub.s32 4294967266, %v732_v11  ;;  %v734_v49 = vshll.u32 %v725_v21, %v732_v11  ;;  %vm1072_vm5 = vcmp.eq.s32.totalorder %v1067_v38, 2 }
 0x1bd   : > { %v930_v36 = vadd.s32 536870912, %v929_v1  ;;  %vm1069_vm7 = vcmp.eq.s32.totalorder %v1067_v38, 0  ;;  %vm1068_vm8 = vcmp.lt.s32.totalorder %v1067_v38, 2  ;;  %vm4026_vm9 = vcmp.le.f32.partialorder %v661_v43, 0.7853982 }
 0x1be   : > { %v735_v63 = vshrl.u32 %v717_v40, %v733_v48  ;;  %v738_v61 = vadd.s32 127, %v737_v34  ;;  %v748_v32 = vsel %vm663_vm6, %v747_v0, %v3952_v44  ;;  %v1529_v9 = vmul.f32 1.442695, %v1521_v62 }
 0x1bf   : > { %v4015_v27 = vshrl.u32 %v930_v36, 30  ;;  %v750_v43 = vsel %vm4026_vm9, 0, %v748_v32  ;;  %v925_v14 = vadd.s32 %v3996_v4, %v4002_v30  ;;  %vm753_vm15 = vweird.f32 %v3235_v53  ;;  %v1574_v32 = vpop.permute.xlu1 %1573 }
 0x1c0   : > { %v736_v39 = vor.u32 %v735_v63, %v734_v49  ;;  %v739_v13 = vshll.u32 %v738_v61, 23  ;;  %v754_v23 = vadd.s32 3, %v750_v43  ;;  %v1505_v49 = vmul.f32 %v3232_v52, %v3265_v42 }
 0x1c1   : > { %v932_v56 = vshll.u32 %v4015_v27, 30  ;;  %vm871_vm2 = vcmp.lt.s32.totalorder %v3238_v55, 0  ;;  %vm4046_vm3 = vcmp.le.f32.partialorder %v869_v46, 0.7853982  ;;  %vm1581_vm4 = vcmask 130048  }
 0x1c2   : > { %v2928_v15 = vpop.eup %2927  ;;  %v740_v18 = vor.u32 4788187, %v739_v13  ;;  %v743_v17 = vcvt.s32.f32 %v736_v39  ;;  %v755_v11 = vand.u32 3, %v754_v23  ;;  %v955_v39 = vsub.s32 4, %v4015_v27 }
 0x1c3   : > { %v2930_v26 = vpop.eup %2929  ;;  %v1073_v5 = vxor.u32 2147483648, %v2928_v15  ;;  %v933_v25 = vsub.s32 %v929_v1, %v932_v56  ;;  %v4290_v56 = vmov 0.0  }
 0x1c4   : > { %v1070_v2 = vxor.u32 2147483648, %v2930_v26  ;;  %v741_v6 = vand.u32 2147483647, %v740_v18  ;;  %vm760_vm12 = vcmp.eq.s32.totalorder %v755_v11, 2  ;;  %vm757_vm13 = vcmp.eq.s32.totalorder %v755_v11, 0 }
 0x1c5   : > { %v1074_v21 = vsel %vm1072_vm5, %v1073_v5, %v2930_v26  ;;  %v2932_v45 = vpop.eup %2931  ;;  %v935_v50 = vsub.s32 0, %v933_v25  ;;  %vm756_vm14 = vcmp.lt.s32.totalorder %v755_v11, 2  ;;  %v1553_v5 = vld [vmem:[%s4228_s3] sm:$0xff] }
 0x1c6   : > { %v1071_v54 = vsel %vm1069_vm7, %v2928_v15, %v1070_v2  ;;  %v744_v16 = vmul.f32 %v743_v17, %v741_v6  ;;  %v1523_v15 = vadd.f32 %v3673_v41, %v1505_v49  ;;  %v956_v41 = vsel %vm871_vm2, %v955_v39, %v4015_v27  ;;  %v1554_v2 = vld [vmem:[%s4228_s3 + $0x8] sm:$0xff]  ;;  %v1555_v27 = vld [vmem:[%s4228_s3 + $0x10] sm:$0xff] }
 0x1c7   : > { %v1075_v29 = vsel %vm1068_vm8, %v1071_v54, %v1074_v21  ;;  %v2731_v31 = vmin.u32 %v935_v50, %v933_v25  ;;  %v958_v6 = vsel %vm4046_vm3, 0, %v956_v41 }
 0x1c8   : > { %v1076_v57 = vsel %vm1065_vm10, nan, %v1075_v29  ;;  %v745_v60 = vxor.u32 2147483648, %v744_v16  ;;  %v1533_v46 = vmul.f32 1.442695, %v1523_v15  ;;  %v962_v17 = vadd.s32 3, %v958_v6  ;;  %v1790_v15 = vld [vmem:[%s4230_s5 + $0x10] sm:$0xff] }
 0x1c9   : > { %v1548_v24 = vmul.f32 %v2932_v45, %v1076_v57  ;;  %v937_v20 = vclz %v2731_v31  ;;  %vm961_vm10 = vweird.f32 %v3238_v55 }
 0x1ca   : > { %v746_v58 = vsel %vm663_vm6, %v745_v60, %v744_v16  ;;  %v963_v21 = vand.u32 3, %v962_v17  ;;  %vm1816_vm6 = vcmask 261120  }
 0x1cb   : > { %1713 = vmatprep.subr.mxu1 %v1548_v24  ;;  %v749_v59 = vsel %vm4026_vm9, %v3235_v53, %v746_v58  ;;  %v2732_v33 = vadd.s32 4294967294, %v937_v20 }
 0x1cc   : > { %2933 = vcosq.f32 %v749_v59  ;;  %vm968_vm5 = vcmp.eq.s32.totalorder %v963_v21, 2  ;;  %vm965_vm7 = vcmp.eq.s32.totalorder %v963_v21, 0  ;;  %vm964_vm8 = vcmp.lt.s32.totalorder %v963_v21, 2 }
 0x1cd   : > { %2935 = vsinq.f32 %v749_v59  ;;  %vm2733_vm11 = vcmp.lt.s32.totalorder %v2732_v33, 0  ;;  %v1579_v59 = vpop.permute.xlu0 %1578 }
 0x1ce   : > { %v940_v7 = vsel %vm2733_vm11, 0, %v2732_v33  ;;  %2937 = vpow2.f32 %v1529_v9 }
 0x1cf   : > { %v941_v10 = vsub.s32 32, %v940_v7  ;;  %v945_v35 = vsub.s32 4294967266, %v940_v7  ;;  %v942_v22 = vshll.u32 %v933_v25, %v940_v7  ;;  %v1556_v25 = vld [vmem:[%s4228_s3 + $0x18] sm:$0xff] }
 0x1d1   : > { %v943_v19 = vshrl.u32 %v925_v14, %v941_v10  ;;  %v946_v3 = vadd.s32 127, %v945_v35  ;;  %v1569_v10 = vpop.permute.xlu0 %1568 }
 0x1d3   : > { %v944_v47 = vor.u32 %v943_v19, %v942_v22  ;;  %v947_v44 = vshll.u32 %v946_v3, 23  ;;  %v1564_v19 = vpop.permute.xlu1 %1563 }
 0x1d5   : > { %v948_v37 = vor.u32 4788187, %v947_v44  ;;  %v951_v34 = vcvt.s32.f32 %v944_v47 }
 0x1d7   : > { %v949_v48 = vand.u32 2147483647, %v948_v37 }
 0x1d9   : > { %v2934_v40 = vpop.eup %2933  ;;  %v952_v30 = vmul.f32 %v951_v34, %v949_v48 }
 0x1da   : > { %v2936_v12 = vpop.eup %2935  ;;  %v761_v1 = vxor.u32 2147483648, %v2934_v40 }
 0x1db   : > { %v758_v4 = vxor.u32 2147483648, %v2936_v12  ;;  %v953_v36 = vxor.u32 2147483648, %v952_v30  ;;  %v2938_v13 = vpop.eup %2937 }
 0x1dc   : > { %v762_v63 = vsel %vm760_vm12, %v761_v1, %v2936_v12 }
 0x1dd   : > { %v759_v61 = vsel %vm757_vm13, %v2934_v40, %v758_v4  ;;  %v954_v42 = vsel %vm871_vm2, %v953_v36, %v952_v30  ;;  %v1788_v30 = vld [vmem:[%s4230_s5] sm:$0xff]  ;;  %v1789_v36 = vld [vmem:[%s4230_s5 + $0x8] sm:$0xff] }
 0x1de   : > { %v763_v38 = vsel %vm756_vm14, %v759_v61, %v762_v63  ;;  %v957_v53 = vsel %vm4046_vm3, %v3238_v55, %v954_v42 }
 0x1df   : > { %v764_v18 = vsel %vm753_vm15, nan, %v763_v38  ;;  %2939 = vcosq.f32 %v957_v53  ;;  %v2945_v38 = vld [vmem:[%s3149_s23] sm:$0x77] }
 0x1e0   : > { %v1545_v26 = vmul.f32 %v2938_v13, %v764_v18  ;;  %2941 = vsinq.f32 %v957_v53  ;;  %v1791_v53 = vld [vmem:[%s4230_s5 + $0x18] sm:$0xff] }
 0x1e1   : > { %2943 = vpow2.f32 %v1533_v46 }
 0x1e2   : > { %1625 = vmatpush1.msra.mxu0 %v1545_v26 }
 0x1e3   : > { %2754 = vmatmul.mubr.msk.f32.vlgmr.msra.gmra.mxu0 %vm1581_vm4, %v1553_v5 }
 0x1e4   : > { %1664 = vmatprep.mubr.f32.mxu0 %v4290_v56 }
 0x1e7   : > { %2755 = vmatmul.mubr.msk.f32.gmra.mxu0 %vm1581_vm4, %v1554_v2 }
 0x1e8   : > { %1670 = vmatprep.mubr.f32.mxu0 %v4290_v56 }
 0x1eb   : > { %2756 = vmatmul.mubr.msk.f32.gmra.mxu0 %vm1581_vm4, %v1555_v27 }
 0x1ec   : > { %1676 = vmatprep.mubr.f32.mxu0 %v4290_v56  ;;  %v2940_v28 = vpop.eup %2939 }
 0x1ed   : > { %v2942_v54 = vpop.eup %2941  ;;  %v969_v16 = vxor.u32 2147483648, %v2940_v28 }
 0x1ee   : > { %v966_v45 = vxor.u32 2147483648, %v2942_v54  ;;  %v2944_v60 = vpop.eup %2943 }
 0x1ef   : > { %2757 = vmatmul.mubr.msk.f32.gmra.mxu0 %vm1581_vm4, %v1556_v25  ;;  %v970_v29 = vsel %vm968_vm5, %v969_v16, %v2942_v54 }
 0x1f0   : > { %1893 = vmatprep.mubr.f32.mxu0 %v4290_v56  ;;  %v967_v50 = vsel %vm965_vm7, %v2940_v28, %v966_v45 }
 0x1f1   : > { %v971_v57 = vsel %vm964_vm8, %v967_v50, %v970_v29  ;;  %v4291_v29 = vld [vmem:[#allocation7_spill] sm:$0xff]  ;;  %v2946_v50 = vld [vmem:[%s3149_s23 + $0x8] sm:$0x77] }
 0x1f2   : > { %v972_v24 = vsel %vm961_vm10, nan, %v971_v57  ;;  %v2027_v57 = vld [vmem:[%s4233_s8] sm:$0xff] }
 0x1f3   : > { %v1547_v0 = vmul.f32 %v2944_v60, %v972_v24  ;;  %v2028_v60 = vld [vmem:[%s4233_s8 + $0x8] sm:$0xff]  ;;  %v2029_v24 = vld [vmem:[%s4233_s8 + $0x10] sm:$0xff] }
 0x1f5   : > { %1714 = vmatpush1.msra.mxu1 %v1547_v0  ;;  %v2030_v0 = vld [vmem:[%s4233_s8 + $0x18] sm:$0xff] }
 0x1f6   : > { %2758 = vmatmul.mubr.msk.f32.vlgmr.msra.gmra.mxu1 %vm1581_vm4, %v1553_v5 }
 0x1f7   : > { %1753 = vmatprep.mubr.f32.mxu1 %v4290_v56 }
 0x1fa   : > { %2759 = vmatmul.mubr.msk.f32.gmra.mxu1 %vm1581_vm4, %v1554_v2 }
 0x1fb   : > { %1759 = vmatprep.mubr.f32.mxu1 %v4290_v56 }
 0x1fe   : > { %2760 = vmatmul.mubr.msk.f32.gmra.mxu1 %vm1581_vm4, %v1555_v27 }
 0x1ff   : > { %1765 = vmatprep.mubr.f32.mxu1 %v4290_v56 }
 0x202   : > { %2761 = vmatmul.mubr.msk.f32.gmra.mxu1 %vm1581_vm4, %v1556_v25 }
 0x203   : > { %1982 = vmatprep.mubr.f32.mxu1 %v4290_v56 }
 0x2a3   : > { %v1660_v55 = vpop.f32.mrf.mxu0 }
 0x2a4   : > { %v1661_v37 = vadd.f32 %v1660_v55, %v1564_v19 }
 0x2a5   : > { %v1662_v31 = vpop.f32.mrf.mxu0 }
 0x2a6   : > { %v1663_v44 = vadd.f32 %v1662_v31, %v1564_v19  ;;  %v1772_v4 = vmax.f32 %v1661_v37, 0.0 }
 0x2a7   : > { %v1666_v62 = vpop.f32.mrf.mxu0 }
 0x2a8   : > { %v1667_v3 = vadd.f32 %v1666_v62, %v1569_v10  ;;  %v1773_v1 = vmax.f32 %v1663_v44, 0.0 }
 0x2a9   : > { %v1668_v51 = vpop.f32.mrf.mxu0 }
 0x2aa   : > { %v1669_v23 = vadd.f32 %v1668_v51, %v1569_v10  ;;  %v1776_v12 = vmax.f32 %v1667_v3, 0.0 }
 0x2ab   : > { %v1672_v58 = vpop.f32.mrf.mxu0 }
 0x2ac   : > { %v1673_v35 = vadd.f32 %v1672_v58, %v1574_v32  ;;  %v1777_v34 = vmax.f32 %v1669_v23, 0.0 }
 0x2ad   : > { %v1674_v20 = vpop.f32.mrf.mxu0 }
 0x2ae   : > { %v1675_v7 = vadd.f32 %v1674_v20, %v1574_v32  ;;  %v1780_v40 = vmax.f32 %v1673_v35, 0.0 }
 0x2af   : > { %v1678_v33 = vpop.f32.mrf.mxu0 }
 0x2b0   : > { %v1679_v9 = vadd.f32 %v1678_v33, %v1579_v59  ;;  %v1781_v11 = vmax.f32 %v1675_v7, 0.0 }
 0x2b1   : > { %v1680_v43 = vpop.f32.mrf.mxu0 }
 0x2b2   : > { %v1681_v14 = vadd.f32 %v1680_v43, %v1579_v59  ;;  %v1784_v47 = vmax.f32 %v1679_v9, 0.0 }
 0x2b4   : > { %v1785_v22 = vmax.f32 %v1681_v14, 0.0 }
 0x2b6   : > { %1853 = vmatprep.subr.mxu0 %v1785_v22  ;;  %v1749_v48 = vpop.f32.mrf.mxu1 }
 0x2b7   : > { %1854 = vmatpush1.msra.mxu0 %v1784_v47  ;;  %v1750_v21 = vadd.f32 %v1749_v48, %v1564_v19 }
 0x2b8   : > { %1855 = vmatprep.subr.mxu0 %v1781_v11  ;;  %v1751_v49 = vpop.f32.mrf.mxu1 }
 0x2b9   : > { %1856 = vmatpush1.msra.mxu0 %v1780_v40  ;;  %v1752_v17 = vadd.f32 %v1751_v49, %v1564_v19  ;;  %v1774_v45 = vmax.f32 %v1750_v21, 0.0 }
 0x2ba   : > { %1857 = vmatprep.subr.mxu0 %v1777_v34  ;;  %v1755_v63 = vpop.f32.mrf.mxu1 }
 0x2bb   : > { %1858 = vmatpush1.msra.mxu0 %v1776_v12  ;;  %v1756_v2 = vadd.f32 %v1755_v63, %v1569_v10  ;;  %v1775_v16 = vmax.f32 %v1752_v17, 0.0 }
 0x2bc   : > { %1859 = vmatprep.subr.mxu0 %v1773_v1  ;;  %v1757_v61 = vpop.f32.mrf.mxu1 }
 0x2bd   : > { %1860 = vmatpush1.msra.mxu0 %v1772_v4  ;;  %v1758_v41 = vadd.f32 %v1757_v61, %v1569_v10  ;;  %v1778_v54 = vmax.f32 %v1756_v2, 0.0 }
 0x2be   : > { %2762 = vmatmul.mubr.msk.f32.vlgmr.msra.gmra.mxu0 %vm1816_vm6, %v1788_v30  ;;  %2770 = vmatprep.subr.msk.mxu0 %vm438_vm0, %v3153_v8  ;;  %v1761_v39 = vpop.f32.mrf.mxu1 }
 0x2bf   : > { %1899 = vmatprep.mubr.f32.mxu0 %v4290_v56  ;;  %2771 = vmatpush1.msk.msra.mxu0 %vm438_vm0, %v2945_v38  ;;  %v1762_v5 = vadd.f32 %v1761_v39, %v1574_v32  ;;  %v1779_v28 = vmax.f32 %v1758_v41, 0.0 }
 0x2c0   : > { %v1763_v13 = vpop.f32.mrf.mxu1 }
 0x2c1   : > { %v1764_v42 = vadd.f32 %v1763_v13, %v1574_v32  ;;  %v1782_v25 = vmax.f32 %v1762_v5, 0.0  ;;  %v1809_v32 = vpop.permute.xlu1 %1808  ;;  %v2025_v13 = vld [vmem:[%s4232_s7 + $0x10] sm:$0xff] }
 0x2c2   : > { %2763 = vmatmul.mubr.msk.f32.gmra.mxu0 %vm1816_vm6, %v1789_v36  ;;  %v1767_v8 = vpop.f32.mrf.mxu1 }
 0x2c3   : > { %1905 = vmatprep.mubr.f32.mxu0 %v4290_v56  ;;  %v1768_v18 = vadd.f32 %v1767_v8, %v1579_v59  ;;  %v1783_v27 = vmax.f32 %v1764_v42, 0.0 }
 0x2c4   : > { %v1769_v52 = vpop.f32.mrf.mxu1 }
 0x2c5   : > { %v1770_v26 = vadd.f32 %v1769_v52, %v1579_v59  ;;  %v1786_v6 = vmax.f32 %v1768_v18, 0.0  ;;  %v1814_v59 = vpop.permute.xlu0 %1813  ;;  %v1799_v19 = vpop.permute.xlu1 %1798 }
 0x2c6   : > { %2764 = vmatmul.mubr.msk.f32.gmra.mxu0 %vm1816_vm6, %v1790_v15 }
 0x2c7   : > { %1911 = vmatprep.mubr.f32.mxu0 %v4290_v56  ;;  %v1787_v46 = vmax.f32 %v1770_v26, 0.0  ;;  %v2026_v26 = vld [vmem:[%s4232_s7 + $0x18] sm:$0xff] }
 0x2c9   : > { %1942 = vmatprep.subr.mxu1 %v1787_v46  ;;  %v1804_v10 = vpop.permute.xlu0 %1803 }
 0x2ca   : > { %2765 = vmatmul.mubr.msk.f32.gmra.mxu0 %vm1816_vm6, %v1791_v53  ;;  %1943 = vmatpush1.msra.mxu1 %v1786_v6 }
 0x2cb   : > { %2107 = vmatprep.mubr.f32.mxu0 %v4290_v56  ;;  %1944 = vmatprep.subr.mxu1 %v1783_v27 }
 0x2cc   : > { %1945 = vmatpush1.msra.mxu1 %v1782_v25 }
 0x2cd   : > { %1946 = vmatprep.subr.mxu1 %v1779_v28 }
 0x2ce   : > { %1947 = vmatpush1.msra.mxu1 %v1778_v54  ;;  %2772 = vmatmul.mubr.msk.f32.vlgmr.msra.gmra.mxu0 %vm425_vm1, %v2027_v57 }
 0x2cf   : > { %1948 = vmatprep.subr.mxu1 %v1775_v16  ;;  %2113 = vmatprep.mubr.f32.mxu0 %v4290_v56 }
 0x2d0   : > { %1949 = vmatpush1.msra.mxu1 %v1774_v45 }
 0x2d1   : > { %2766 = vmatmul.mubr.msk.f32.vlgmr.msra.gmra.mxu1 %vm1816_vm6, %v1788_v30  ;;  %2776 = vmatprep.subr.msk.mxu1 %vm438_vm0, %v4291_v29  ;;  %v2023_v30 = vld [vmem:[%s4232_s7] sm:$0xff] }
 0x2d2   : > { %1988 = vmatprep.mubr.f32.mxu1 %v4290_v56  ;;  %2777 = vmatpush1.msk.msra.mxu1 %vm438_vm0, %v2946_v50 }
 0x2d3   : > { %2773 = vmatmul.mubr.msk.f32.gmra.mxu0 %vm425_vm1, %v2028_v60 }
 0x2d4   : > { %2119 = vmatprep.mubr.f32.mxu0 %v4290_v56 }
 0x2d5   : > { %2767 = vmatmul.mubr.msk.f32.gmra.mxu1 %vm1816_vm6, %v1789_v36  ;;  %v2024_v36 = vld [vmem:[%s4232_s7 + $0x8] sm:$0xff] }
 0x2d6   : > { %1994 = vmatprep.mubr.f32.mxu1 %v4290_v56 }
 0x2d7   : > { %2774 = vmatmul.mubr.msk.f32.gmra.mxu0 %vm425_vm1, %v2029_v24 }
 0x2d8   : > { %2125 = vmatprep.mubr.f32.mxu0 %v4290_v56 }
 0x2d9   : > { %2768 = vmatmul.mubr.msk.f32.gmra.mxu1 %vm1816_vm6, %v1790_v15 }
 0x2da   : > { %2000 = vmatprep.mubr.f32.mxu1 %v4290_v56 }
 0x2db   : > { %2775 = vmatmul.mubr.msk.f32.gmra.mxu0 %vm425_vm1, %v2030_v0 }
 0x2dc   : > { %2297 = vmatprep.mubr.f32.mxu0 %v4290_v56 }
 0x2dd   : > { %2769 = vmatmul.mubr.msk.f32.gmra.mxu1 %vm1816_vm6, %v1791_v53 }
 0x2de   : > { %2196 = vmatprep.mubr.f32.mxu1 %v4290_v56 }
 0x2e1   : > { %2778 = vmatmul.mubr.msk.f32.vlgmr.msra.gmra.mxu1 %vm425_vm1, %v2027_v57 }
 0x2e2   : > { %2202 = vmatprep.mubr.f32.mxu1 %v4290_v56 }
 0x2e5   : > { %2779 = vmatmul.mubr.msk.f32.gmra.mxu1 %vm425_vm1, %v2028_v60 }
 0x2e6   : > { %2208 = vmatprep.mubr.f32.mxu1 %v4290_v56 }
 0x2e9   : > { %2780 = vmatmul.mubr.msk.f32.gmra.mxu1 %vm425_vm1, %v2029_v24 }
 0x2ea   : > { %2214 = vmatprep.mubr.f32.mxu1 %v4290_v56 }
 0x2ed   : > { %2781 = vmatmul.mubr.msk.f32.gmra.mxu1 %vm425_vm1, %v2030_v0 }
 0x2ee   : > { %2386 = vmatprep.mubr.f32.mxu1 %v4290_v56 }
 0x37e   : > { %v1895_v55 = vpop.f32.mrf.mxu0 }
 0x37f   : > { %v1896_v37 = vadd.f32 %v1895_v55, %v1799_v19 }
 0x380   : > { %v1897_v31 = vpop.f32.mrf.mxu0 }
 0x381   : > { %v1898_v44 = vadd.f32 %v1897_v31, %v1799_v19  ;;  %v2007_v4 = vmax.f32 %v1896_v37, 0.0 }
 0x382   : > { %v1901_v62 = vpop.f32.mrf.mxu0 }
 0x383   : > { %v1902_v3 = vadd.f32 %v1901_v62, %v1804_v10  ;;  %v2008_v1 = vmax.f32 %v1898_v44, 0.0 }
 0x384   : > { %v1903_v51 = vpop.f32.mrf.mxu0 }
 0x385   : > { %v1904_v23 = vadd.f32 %v1903_v51, %v1804_v10  ;;  %v2011_v12 = vmax.f32 %v1902_v3, 0.0 }
 0x386   : > { %v1907_v58 = vpop.f32.mrf.mxu0 }
 0x387   : > { %v1908_v35 = vadd.f32 %v1907_v58, %v1809_v32  ;;  %v2012_v34 = vmax.f32 %v1904_v23, 0.0 }
 0x388   : > { %v1909_v20 = vpop.f32.mrf.mxu0 }
 0x389   : > { %v1910_v7 = vadd.f32 %v1909_v20, %v1809_v32  ;;  %v2015_v40 = vmax.f32 %v1908_v35, 0.0 }
 0x38a   : > { %v1913_v33 = vpop.f32.mrf.mxu0 }
 0x38b   : > { %v1914_v9 = vadd.f32 %v1913_v33, %v1814_v59  ;;  %v2016_v11 = vmax.f32 %v1910_v7, 0.0 }
 0x38c   : > { %v1915_v43 = vpop.f32.mrf.mxu0 }
 0x38d   : > { %v1916_v14 = vadd.f32 %v1915_v43, %v1814_v59  ;;  %v2019_v47 = vmax.f32 %v1914_v9, 0.0 }
 0x38e   : > { %v2109_v45 = vpop.f32.mrf.mxu0 }
 0x38f   : > { %v2020_v22 = vmax.f32 %v1916_v14, 0.0  ;;  %v2433_v14 = vpop.permute.xlu0 %2432 }
 0x390   : > { %v2111_v29 = vpop.f32.mrf.mxu0 }
 0x391   : > { %2257 = vmatprep.subr.mxu0 %v2020_v22  ;;  %v1984_v48 = vpop.f32.mrf.mxu1  ;;  %v2428_v22 = vpop.permute.xlu1 %2427 }
 0x392   : > { %2258 = vmatpush1.msra.mxu0 %v2019_v47  ;;  %v1985_v27 = vadd.f32 %v1984_v48, %v1799_v19 }
 0x393   : > { %2259 = vmatprep.subr.mxu0 %v2016_v11  ;;  %v1986_v49 = vpop.f32.mrf.mxu1  ;;  %v2115_v50 = vpop.f32.mrf.mxu0 }
 0x394   : > { %2260 = vmatpush1.msra.mxu0 %v2015_v40  ;;  %v1987_v6 = vadd.f32 %v1986_v49, %v1799_v19  ;;  %v2009_v16 = vmax.f32 %v1985_v27, 0.0 }
 0x395   : > { %2261 = vmatprep.subr.mxu0 %v2012_v34  ;;  %v1990_v63 = vpop.f32.mrf.mxu1  ;;  %v2117_v57 = vpop.f32.mrf.mxu0 }
 0x396   : > { %2262 = vmatpush1.msra.mxu0 %v2011_v12  ;;  %v1991_v46 = vadd.f32 %v1990_v63, %v1804_v10  ;;  %v2010_v54 = vmax.f32 %v1987_v6, 0.0 }
 0x397   : > { %2263 = vmatprep.subr.mxu0 %v2008_v1  ;;  %v1992_v61 = vpop.f32.mrf.mxu1  ;;  %v2121_v60 = vpop.f32.mrf.mxu0 }
 0x398   : > { %2264 = vmatpush1.msra.mxu0 %v2007_v4  ;;  %v1993_v5 = vadd.f32 %v1992_v61, %v1804_v10  ;;  %v2013_v28 = vmax.f32 %v1991_v46, 0.0  ;;  %v2423_v1 = vpop.permute.xlu0 %2422 }
 0x399   : > { %2782 = vmatmul.mubr.msk.f32.vlgmr.msra.gmra.mxu0 %vm1816_vm6, %v2023_v30  ;;  %v1996_v38 = vpop.f32.mrf.mxu1  ;;  %v2123_v24 = vpop.f32.mrf.mxu0 }
 0x39a   : > { %2303 = vmatprep.mubr.f32.mxu0 %v4290_v56  ;;  %v1997_v53 = vadd.f32 %v1996_v38, %v1809_v32  ;;  %v2014_v25 = vmax.f32 %v1993_v5, 0.0 }
 0x39b   : > { %v1998_v39 = vpop.f32.mrf.mxu1  ;;  %v2127_v55 = vpop.f32.mrf.mxu0 }
 0x39c   : > { %v1999_v52 = vadd.f32 %v1998_v39, %v1809_v32  ;;  %v2017_v21 = vmax.f32 %v1997_v53, 0.0 }
 0x39d   : > { %2783 = vmatmul.mubr.msk.f32.gmra.mxu0 %vm1816_vm6, %v2024_v36  ;;  %v2002_v15 = vpop.f32.mrf.mxu1  ;;  %v2129_v62 = vpop.f32.mrf.mxu0 }
 0x39e   : > { %2309 = vmatprep.mubr.f32.mxu0 %v4290_v56  ;;  %v2003_v8 = vadd.f32 %v2002_v15, %v1814_v59  ;;  %v2018_v17 = vmax.f32 %v1999_v52, 0.0 }
 0x39f   : > { %v2004_v18 = vpop.f32.mrf.mxu1 }
 0x3a0   : > { %v2005_v42 = vadd.f32 %v2004_v18, %v1814_v59  ;;  %v2021_v2 = vmax.f32 %v2003_v8, 0.0 }
 0x3a1   : > { %2784 = vmatmul.mubr.msk.f32.gmra.mxu0 %vm1816_vm6, %v2025_v13  ;;  %v4177_v0 = vpop.f32.mrf.mxu1 }
 0x3a2   : > { %2315 = vmatprep.mubr.f32.mxu0 %v4290_v56  ;;  %v2022_v41 = vmax.f32 %v2005_v42, 0.0 }
 0x3a3   : > { %v4179_v31 = vpop.f32.mrf.mxu1 }
 0x3a4   : > { %2346 = vmatprep.subr.mxu1 %v2022_v41 }
 0x3a5   : > { %2785 = vmatmul.mubr.msk.f32.gmra.mxu0 %vm1816_vm6, %v2026_v26  ;;  %2347 = vmatpush1.msra.mxu1 %v2021_v2  ;;  %v4181_v51 = vpop.f32.mrf.mxu1  ;;  %v2467_v2 = vld [vmem:[%s4235_s10] sm:$0x7] }
 0x3a6   : > { %2541 = vmatprep.mubr.f32.mxu0 %v4290_v56  ;;  %2348 = vmatprep.subr.mxu1 %v2018_v17 }
 0x3a7   : > { %2349 = vmatpush1.msra.mxu1 %v2017_v21  ;;  %v2206_v20 = vpop.f32.mrf.mxu1 }
 0x3a8   : > { %2350 = vmatprep.subr.mxu1 %v2014_v25 }
 0x3a9   : > { %2351 = vmatpush1.msra.mxu1 %v2013_v28 }
 0x3aa   : > { %2352 = vmatprep.subr.mxu1 %v2010_v54 }
 0x3ab   : > { %2353 = vmatpush1.msra.mxu1 %v2009_v16 }
 0x3ac   : > { %2786 = vmatmul.mubr.msk.f32.vlgmr.msra.gmra.mxu1 %vm1816_vm6, %v2023_v30 }
 0x3ad   : > { %2392 = vmatprep.mubr.f32.mxu1 %v4290_v56 }
 0x3b0   : > { %2787 = vmatmul.mubr.msk.f32.gmra.mxu1 %vm1816_vm6, %v2024_v36  ;;  %v2418_v36 = vpop.permute.xlu1 %2417 }
 0x3b1   : > { %2398 = vmatprep.mubr.f32.mxu1 %v4290_v56 }
 0x3b4   : > { %2788 = vmatmul.mubr.msk.f32.gmra.mxu1 %vm1816_vm6, %v2025_v13 }
 0x3b5   : > { %2404 = vmatprep.mubr.f32.mxu1 %v4290_v56 }
 0x3b8   : > { %2789 = vmatmul.mubr.msk.f32.gmra.mxu1 %vm1816_vm6, %v2026_v26 }
 0x3b9   : > { %2612 = vmatprep.mubr.f32.mxu1 %v4290_v56  ;;  %v2210_v56 = vpop.f32.mrf.mxu1 }
 0x3bb   : > { %v2212_v7 = vpop.f32.mrf.mxu1 }
 0x3bd   : > { %v2216_v47 = vpop.f32.mrf.mxu1 }
 0x3bf   : > { %v2218_v30 = vpop.f32.mrf.mxu1 }
 0x459   : > { %v2299_v58 = vpop.f32.mrf.mxu0 }
 0x45a   : > { %v2300_v49 = vadd.f32 %v2299_v58, %v2109_v45 }
 0x45b   : > { %v2301_v59 = vpop.f32.mrf.mxu0 }
 0x45c   : > { %v2302_v48 = vadd.f32 %v2301_v59, %v2111_v29  ;;  %v2435_v18 = vadd.f32 %v2418_v36, %v2300_v49 }
 0x45d   : > { %v2305_v32 = vpop.f32.mrf.mxu0 }
 0x45e   : > { %v2306_v37 = vadd.f32 %v2305_v32, %v2115_v50  ;;  %v2436_v15 = vadd.f32 %v2418_v36, %v2302_v48  ;;  %v2451_v46 = vmax.f32 %v2435_v18, 0.0 }
 0x45f   : > { %v2307_v33 = vpop.f32.mrf.mxu0 }
 0x460   : > { %v2308_v44 = vadd.f32 %v2307_v33, %v2117_v57  ;;  %v2439_v38 = vadd.f32 %v2423_v1, %v2306_v37  ;;  %v2452_v5 = vmax.f32 %v2436_v15, 0.0 }
 0x461   : > { %v2311_v9 = vpop.f32.mrf.mxu0 }
 0x462   : > { %v2312_v19 = vadd.f32 %v2311_v9, %v2121_v60  ;;  %v2440_v63 = vadd.f32 %v2423_v1, %v2308_v44  ;;  %v2455_v53 = vmax.f32 %v2439_v38, 0.0 }
 0x463   : > { %v2313_v43 = vpop.f32.mrf.mxu0 }
 0x464   : > { %v2314_v35 = vadd.f32 %v2313_v43, %v2123_v24  ;;  %v2443_v4 = vadd.f32 %v2428_v22, %v2312_v19  ;;  %v2456_v26 = vmax.f32 %v2440_v63, 0.0 }
 0x465   : > { %v2317_v10 = vpop.f32.mrf.mxu0 }
 0x466   : > { %v2318_v23 = vadd.f32 %v2317_v10, %v2127_v55  ;;  %v2444_v34 = vadd.f32 %v2428_v22, %v2314_v35  ;;  %v2459_v52 = vmax.f32 %v2443_v4, 0.0  ;;  %v2472_v35 = vpop.permute.xlu0 %2471 }
 0x467   : > { %v2319_v3 = vpop.f32.mrf.mxu0 }
 0x468   : > { %v2320_v11 = vadd.f32 %v2319_v3, %v2129_v62  ;;  %v2447_v40 = vadd.f32 %v2433_v14, %v2318_v23  ;;  %v2460_v8 = vmax.f32 %v2444_v34, 0.0 }
 0x46a   : > { %v2448_v12 = vadd.f32 %v2433_v14, %v2320_v11  ;;  %v2463_v39 = vmax.f32 %v2447_v40, 0.0 }
 0x46c   : > { %v2464_v61 = vmax.f32 %v2448_v12, 0.0  ;;  %v2388_v13 = vpop.f32.mrf.mxu1 }
 0x46d   : > { %v2389_v62 = vadd.f32 %v2388_v13, %v4177_v0 }
 0x46e   : > { %2501 = vmatprep.subr.mxu0 %v2464_v61  ;;  %v2390_v42 = vpop.f32.mrf.mxu1 }
 0x46f   : > { %2502 = vmatpush1.msra.mxu0 %v2463_v39  ;;  %v2391_v60 = vadd.f32 %v2390_v42, %v4179_v31 }
 0x470   : > { %2503 = vmatprep.subr.mxu0 %v2460_v8  ;;  %v2394_v41 = vpop.f32.mrf.mxu1 }
 0x471   : > { %2504 = vmatpush1.msra.mxu0 %v2459_v52  ;;  %v2395_v50 = vadd.f32 %v2394_v41, %v4181_v51  ;;  %v2438_v43 = vadd.f32 %v2418_v36, %v2391_v60 }
 0x472   : > { %2505 = vmatprep.subr.mxu0 %v2456_v26  ;;  %v2396_v6 = vpop.f32.mrf.mxu1 }
 0x473   : > { %2506 = vmatpush1.msra.mxu0 %v2455_v53  ;;  %v2397_v45 = vadd.f32 %v2396_v6, %v2206_v20  ;;  %v2441_v33 = vadd.f32 %v2423_v1, %v2395_v50  ;;  %v2437_v20 = vadd.f32 %v2418_v36, %v2389_v62  ;;  %v2454_v31 = vmax.f32 %v2438_v43, 0.0 }
 0x474   : > { %2507 = vmatprep.subr.mxu0 %v2452_v5  ;;  %v2400_v17 = vpop.f32.mrf.mxu1 }
 0x475   : > { %2508 = vmatpush1.msra.mxu0 %v2451_v46  ;;  %v2401_v54 = vadd.f32 %v2400_v17, %v2210_v56  ;;  %v2442_v59 = vadd.f32 %v2423_v1, %v2397_v45  ;;  %v2457_v10 = vmax.f32 %v2441_v33, 0.0 }
 0x476   : > { %2790 = vmatmul.mubr.msk.f32.vlgmr.msra.gmra.mxu0 %vm1816_vm6, %v2467_v2  ;;  %v2402_v27 = vpop.f32.mrf.mxu1 }
 0x477   : > { %v2403_v25 = vadd.f32 %v2402_v27, %v2212_v7  ;;  %v2445_v58 = vadd.f32 %v2428_v22, %v2401_v54  ;;  %v2458_v51 = vmax.f32 %v2442_v59, 0.0 }
 0x478   : > { %v2406_v21 = vpop.f32.mrf.mxu1 }
 0x479   : > { %v2407_v28 = vadd.f32 %v2406_v21, %v2216_v47  ;;  %v2446_v24 = vadd.f32 %v2428_v22, %v2403_v25  ;;  %v2461_v56 = vmax.f32 %v2445_v58, 0.0 }
 0x47a   : > { %v2408_v16 = vpop.f32.mrf.mxu1 }
 0x47b   : > { %v2409_v29 = vadd.f32 %v2408_v16, %v2218_v30  ;;  %v2449_v57 = vadd.f32 %v2433_v14, %v2407_v28  ;;  %v2462_v7 = vmax.f32 %v2446_v24, 0.0 }
 0x47d   : > { %v2450_v55 = vadd.f32 %v2433_v14, %v2409_v29  ;;  %v2465_v9 = vmax.f32 %v2449_v57, 0.0  ;;  %v2453_v14 = vmax.f32 %v2437_v20, 0.0 }
 0x47f   : > { %v2466_v32 = vmax.f32 %v2450_v55, 0.0 }
 0x481   : > { %2572 = vmatprep.subr.mxu1 %v2466_v32 }
 0x482   : > { %2573 = vmatpush1.msra.mxu1 %v2465_v9 }
 0x483   : > { %2574 = vmatprep.subr.mxu1 %v2462_v7 }
 0x484   : > { %2575 = vmatpush1.msra.mxu1 %v2461_v56 }
 0x485   : > { %2576 = vmatprep.subr.mxu1 %v2458_v51 }
 0x486   : > { %2577 = vmatpush1.msra.mxu1 %v2457_v10 }
 0x487   : > { %2578 = vmatprep.subr.mxu1 %v2454_v31 }
 0x488   : > { %2579 = vmatpush1.msra.mxu1 %v2453_v14 }
 0x489   : > { %2791 = vmatmul.mubr.msk.f32.vlgmr.msra.gmra.mxu1 %vm1816_vm6, %v2467_v2 }
 0x536   : > { %v2543_v0 = vpop.f32.mrf.mxu0 }
 0x537   : > { %v2544_v22 = vadd.f32 %v2543_v0, %v2472_v35 }
 0x538   : > { %v2545_v23 = vpop.f32.mrf.mxu0 }
 0x539   : > { %v2546_v19 = vadd.f32 %v2545_v23, %v2472_v35 }
 0x53b   : > { %v2623_v3 = vcombine.low %v2544_v22, %v2546_v19 }
 0x53d   : > { %2627 = vst [vmem:[%s407_s16] sm:$0x77] %v2623_v3 }
 0x549   : > { %v2614_v47 = vpop.f32.mrf.mxu1 }
 0x54a   : > { %v2615_v11 = vadd.f32 %v2614_v47, %v2472_v35 }
 0x54b   : > { %v2616_v44 = vpop.f32.mrf.mxu1 }
 0x54c   : > { %v2617_v37 = vadd.f32 %v2616_v44, %v2472_v35 }
 0x54e   : > { %v2624_v40 = vcombine.low %v2615_v11, %v2617_v37 }
 0x550   : > { %2628 = vst [vmem:[%s407_s16 + $0x8] sm:$0x77] %v2624_v40 }
 0x551   : > { %2960 = shalt.err (!%p2957_p3)
}
 0x552   : > { %s2961_s0 = scalar_lea.hbm %s2642_s30, 256  ;;  %s2965_s17 = scalar_lea.hbm %s4237_s12, 1024 }
 0x553   : > { %p2962_p4 = scmp.ne.s32.totalorder %s2642_s30, %s2961_s0  ;;  %p2966_p9 = scmp.lt.s32.totalorder %s2642_s30, %s4237_s12 }
 0x554   : > { %p2967_p10 = scmp.lt.s32.totalorder %s2965_s17, %s2961_s0 }
 0x555   : > { %p2963_p7 = pnand %p2962_p4, %p3121_p5 }
 0x556   : > { %p2968_p11 = por %p2967_p10, %p2966_p9 }
 0x557   : > { %p2964_p8 = pneg %p2963_p7 }
 0x559   : > { %p2969_p12 = pnand %p2968_p11, %p2964_p8 }
 0x55b   : > { %2972 = shalt.err (!%p2969_p12)
}
 0x55c   : > { %2830 = dma.vmem_to_hbm [thread:$0]  (%p3121_p5), %s2645_s18, 256, %s2642_s30, %s2630_s15  }
 0x55d PF: > { %p2836_p13 = scmp.ge.s32.totalorder %s3007_s24, 2  ;;  %s2656_s20 = sand.u32 1, %s2995_s21  }
 0x55e   : > { %s2657_s26 = scalar_lea.sflag [#allocation3], %s2656_s20 }
 0x55f   : > { %p2833_p0 = pnand %p2836_p13, %p3125_p6 }
 0x561   : > { %p2834_p1 = pneg %p2833_p0 }
 0x563   : > { %2990 = dma.done.wait (%p2834_p1), %s2657_s26, 256  }
 0x564   : > { %2992 = vsyncadd (%p2834_p1), %s2657_s26, 4294967040  ;;  %s4292_s0 = sld [smem:[#allocation5_spill]]  ;;  %p22_p2 = scmp.ge.s32.totalorder %s3108_s27, 6  }
 0x565   : > { %s4293_s23 = sld [smem:[#allocation6_spill]]  ;;  %s4294_s21 = smov %s2999_s22 }
 0x566   : > { %s4296_s24 = smov %s3108_s27  ;;  %24 = sbr.rel (!%p22_p2) target bundleno = 5 (0x5), region = 103 }
 0x56a   : > { %s4295_s22 = smov %s4292_s0 }
 0x56b   :  { %2662 = vsyncpa [#allocation3], 1 }
 0x56c   :  { %2664 = vsyncpa [#allocation3 + $0x1], 1 }

</bundles_post_ra>
